<compile_context>
chip_gen: v7x
topology: tpu7x:2x2x1
jax: 0.10.0
libtpu: 0.0.40
codegen_flags: <defaults>
</compile_context>

<pallas_src>
import functools

import jax
import jax.numpy as jnp
from jax import lax
from jax.experimental import pallas as pl
from jax.experimental.pallas import tpu as pltpu

GROWTH = 32
BLOCK_CONFIG = (6, 12, 24, 16)
NUM_INIT_FEATURES = 64
BN_SIZE = 4
BN_EPS = 1e-5
EMB_DIMS = 32
TEXT_IN = 8919

VMEM_LIMIT = 32 * 1024 * 1024   # safe scoped-VMEM request on v5e/v6e/v7x
TM_CAP = 512                    # max matmul row tile
TN_CAP = 256                    # max matmul column tile
ROW_CAP = 2048                  # max row tile for elementwise/pool kernels


def _round_up(x, m):
    return ((x + m - 1) // m) * m


def _pick_tile(m, cap):
    """Largest tile <= cap that divides m (multiple of 8), or m itself if small."""
    if m <= cap:
        return m
    t = (cap // 8) * 8
    while t >= 8:
        if m % t == 0:
            return t
        t -= 8
    return None


# --------------------------------------------------------------------------
# Fused matmul kernels (1x1 convs, stem im2col conv, linear layers)
#   prologue: relu(a * scale_k + shift_k)   (BN+ReLU of the conv input)
#   epilogue: (acc * scale_n + shift_n)[, relu]  (BN+ReLU of the output / bias)
# --------------------------------------------------------------------------

def _mm_plain_kernel(a_ref, b_ref, o_ref):
    o_ref[...] = jnp.dot(a_ref[...], b_ref[...],
                         preferred_element_type=jnp.float32).astype(o_ref.dtype)


def _mm_pre_kernel(a_ref, b_ref, si_ref, ti_ref, o_ref):
    a = a_ref[...].astype(jnp.float32)
    a = jnp.maximum(a * si_ref[...] + ti_ref[...], 0.0)
    o_ref[...] = jnp.dot(a.astype(jnp.bfloat16), b_ref[...],
                         preferred_element_type=jnp.float32).astype(o_ref.dtype)


def _mm_post_kernel(a_ref, b_ref, so_ref, to_ref, o_ref):
    acc = jnp.dot(a_ref[...], b_ref[...], preferred_element_type=jnp.float32)
    o_ref[...] = (acc * so_ref[...] + to_ref[...]).astype(o_ref.dtype)


def _mm_post_relu_kernel(a_ref, b_ref, so_ref, to_ref, o_ref):
    acc = jnp.dot(a_ref[...], b_ref[...], preferred_element_type=jnp.float32)
    acc = acc * so_ref[...] + to_ref[...]
    o_ref[...] = jnp.maximum(acc, 0.0).astype(o_ref.dtype)


def _mm_pre_post_relu_kernel(a_ref, b_ref, si_ref, ti_ref, so_ref, to_ref, o_ref):
    a = a_ref[...].astype(jnp.float32)
    a = jnp.maximum(a * si_ref[...] + ti_ref[...], 0.0)
    acc = jnp.dot(a.astype(jnp.bfloat16), b_ref[...],
                  preferred_element_type=jnp.float32)
    acc = acc * so_ref[...] + to_ref[...]
    o_ref[...] = jnp.maximum(acc, 0.0).astype(o_ref.dtype)


@functools.lru_cache(maxsize=None)
def _build_matmul(m, k, n, tm, tn, has_pre, has_post, post_relu, out_dtype):
    if has_pre and has_post:
        kernel = _mm_pre_post_relu_kernel
    elif has_pre:
        kernel = _mm_pre_kernel
    elif has_post:
        kernel = _mm_post_relu_kernel if post_relu else _mm_post_kernel
    else:
        kernel = _mm_plain_kernel
    in_specs = [pl.BlockSpec((tm, k), lambda i, j: (i, 0)),
                pl.BlockSpec((k, tn), lambda i, j: (0, j))]
    if has_pre:
        in_specs += [pl.BlockSpec((1, k), lambda i, j: (0, 0)),
                     pl.BlockSpec((1, k), lambda i, j: (0, 0))]
    if has_post:
        in_specs += [pl.BlockSpec((1, tn), lambda i, j: (0, j)),
                     pl.BlockSpec((1, tn), lambda i, j: (0, j))]
    out_bytes = 2 if out_dtype == jnp.bfloat16 else 4
    call = pl.pallas_call(
        kernel,
        out_shape=jax.ShapeDtypeStruct((m, n), out_dtype),
        grid=(m // tm, n // tn),
        in_specs=in_specs,
        out_specs=pl.BlockSpec((tm, tn), lambda i, j: (i, j)),
        compiler_params=pltpu.CompilerParams(
            dimension_semantics=("parallel", "parallel"),
            vmem_limit_bytes=VMEM_LIMIT),
        cost_estimate=pl.CostEstimate(
            flops=2 * m * n * k, transcendentals=0,
            bytes_accessed=2 * m * k + 2 * k * n + out_bytes * m * n),
    )
    return jax.jit(call)


def fused_matmul(a, b, *, pre=None, post=None, post_relu=False,
                 out_dtype=jnp.bfloat16):
    """out = epilogue(prologue(a) @ b); bf16 MXU inputs, f32 accumulation."""
    m, k = a.shape
    kb, n = b.shape
    assert k == kb, (k, kb)
    a = a.astype(jnp.bfloat16)
    b = b.astype(jnp.bfloat16)
    kp = _round_up(k, 128)          # keep the contraction dim lane-aligned
    if kp != k:
        a = jnp.pad(a, ((0, 0), (0, kp - k)))
        b = jnp.pad(b, ((0, kp - k), (0, 0)))
    tm = _pick_tile(m, TM_CAP)
    mp = m
    if tm is None:                  # fallback (not hit for this model)
        tm = 256
        mp = _round_up(m, tm)
        a = jnp.pad(a, ((0, mp - m), (0, 0)))
    if n <= TN_CAP:
        tn = n
    elif n % 256 == 0:
        tn = 256
    elif n % 128 == 0:
        tn = 128
    else:
        tn = n
    args = [a, b]
    if pre is not None:
        s, t = pre
        s = s.reshape(1, k).astype(jnp.float32)
        t = t.reshape(1, k).astype(jnp.float32)
        if kp != k:
            s = jnp.pad(s, ((0, 0), (0, kp - k)))
            t = jnp.pad(t, ((0, 0), (0, kp - k)))
        args += [s, t]
    if post is not None:
        s, t = post
        args += [s.reshape(1, n).astype(jnp.float32),
                 t.reshape(1, n).astype(jnp.float32)]
    out = _build_matmul(mp, kp, n, tm, tn, pre is not None, post is not None,
                        bool(post_relu), out_dtype)(*args)
    if mp != m:
        out = out[:m]
    return out


# --------------------------------------------------------------------------
# 3x3 growth conv: per-image kernel, taps folded inside (no im2col in HBM)
# --------------------------------------------------------------------------

def _conv3x3_kernel(x_ref, w_ref, o_ref, *, h, w8, c, cout):
    acc = jnp.zeros((h * w8, cout), jnp.float32)
    for di in range(3):
        for dj in range(3):
            patch = x_ref[0, di:di + h, dj:dj + w8, :]     # (h, w8, c) bf16
            patch = patch.reshape(h * w8, c)
            acc = acc + jnp.dot(patch, w_ref[di, dj],
                                preferred_element_type=jnp.float32)
    o_ref[0] = acc.reshape(h, w8, cout).astype(o_ref.dtype)


@functools.lru_cache(maxsize=None)
def _build_conv3x3(n, h, w8, c, cout):
    hp, wp = h + 2, w8 + 2
    kernel = functools.partial(_conv3x3_kernel, h=h, w8=w8, c=c, cout=cout)
    call = pl.pallas_call(
        kernel,
        out_shape=jax.ShapeDtypeStruct((n, h, w8, cout), jnp.bfloat16),
        grid=(n,),
        in_specs=[pl.BlockSpec((1, hp, wp, c), lambda i: (i, 0, 0, 0)),
                  pl.BlockSpec((3, 3, c, cout), lambda i: (0, 0, 0, 0))],
        out_specs=pl.BlockSpec((1, h, w8, cout), lambda i: (i, 0, 0, 0)),
        compiler_params=pltpu.CompilerParams(
            dimension_semantics=("parallel",),
            vmem_limit_bytes=VMEM_LIMIT),
        cost_estimate=pl.CostEstimate(
            flops=2 * n * h * w8 * 9 * c * cout, transcendentals=0,
            bytes_accessed=2 * n * (hp * wp * c + h * w8 * cout) + 2 * 9 * c * cout),
    )
    return jax.jit(call)


def conv3x3(y, w):
    """3x3 / stride 1 / pad 1 conv (no bias) on an NHWC bf16 activation."""
    n, h, wd, c = y.shape
    w8 = _round_up(wd, 8)           # keep width sublane-aligned (extra cols discarded)
    xp = jnp.pad(y, ((0, 0), (1, 1), (1, 1 + w8 - wd), (0, 0)))
    out = _build_conv3x3(n, h, w8, c, w.shape[-1])(xp, w)
    if w8 != wd:
        out = out[:, :, :wd, :]
    return out


# --------------------------------------------------------------------------
# Pooling kernels: shifted views as separate inputs to one elementwise kernel
# --------------------------------------------------------------------------

def _max9_kernel(*refs):
    o_ref = refs[-1]
    m = refs[0][...].astype(jnp.float32)
    for r in refs[1:-1]:
        m = jnp.maximum(m, r[...].astype(jnp.float32))
    o_ref[...] = m.astype(o_ref.dtype)


def _avg4_kernel(a_ref, b_ref, c_ref, d_ref, o_ref):
    s = (a_ref[...].astype(jnp.float32) + b_ref[...].astype(jnp.float32)
         + c_ref[...].astype(jnp.float32) + d_ref[...].astype(jnp.float32))
    o_ref[...] = (s * 0.25).astype(o_ref.dtype)


@functools.lru_cache(maxsize=None)
def _build_window_reduce(n_windows, rows, c, op):
    tr = _pick_tile(rows, ROW_CAP)
    if tr is None:
        tr = rows
    kernel = _max9_kernel if op == "max" else _avg4_kernel
    call = pl.pallas_call(
        kernel,
        out_shape=jax.ShapeDtypeStruct((rows, c), jnp.bfloat16),
        grid=(rows // tr,),
        in_specs=[pl.BlockSpec((tr, c), lambda i: (i, 0))] * n_windows,
        out_specs=pl.BlockSpec((tr, c), lambda i: (i, 0)),
        compiler_params=pltpu.CompilerParams(
            dimension_semantics=("parallel",),
            vmem_limit_bytes=VMEM_LIMIT),
    )
    return jax.jit(call)


def max_pool_3x3_s2_p1(x):
    n, h, w, c = x.shape
    ho, wo = h // 2, w // 2
    # zero padding is equivalent to -inf padding here: the input is post-ReLU (>= 0)
    xp = jnp.pad(x, ((0, 0), (1, 1), (1, 1), (0, 0)))
    views = []
    for di in range(3):
        for dj in range(3):
            v = xp[:, di:di + 2 * ho - 1:2, dj:dj + 2 * wo - 1:2, :]
            views.append(v.reshape(n * ho * wo, c))
    out = _build_window_reduce(9, n * ho * wo, c, "max")(*views)
    return out.reshape(n, ho, wo, c)


def avg_pool_2x2(x):
    n, h, w, c = x.shape
    ho, wo = h // 2, w // 2
    views = [x[:, di::2, dj::2, :].reshape(n * ho * wo, c)
             for di in range(2) for dj in range(2)]
    out = _build_window_reduce(4, n * ho * wo, c, "avg")(*views)
    return out.reshape(n, ho, wo, c)


# --------------------------------------------------------------------------
# Final norm5 + ReLU + global 7x7 average pool (single fused kernel)
# --------------------------------------------------------------------------

def _final_pool_kernel(x_ref, s_ref, t_ref, o_ref, *, valid):
    x = x_ref[...].astype(jnp.float32)                 # (N, rows_pad, C)
    v = jnp.maximum(x * s_ref[...] + t_ref[...], 0.0)
    idx = lax.broadcasted_iota(jnp.int32, v.shape, 1)
    v = jnp.where(idx < valid, v, 0.0)
    o_ref[...] = jnp.sum(v, axis=1) * (1.0 / valid)


@functools.lru_cache(maxsize=None)
def _build_final_pool(n, rows, c, valid):
    kernel = functools.partial(_final_pool_kernel, valid=valid)
    call = pl.pallas_call(
        kernel,
        out_shape=jax.ShapeDtypeStruct((n, c), jnp.float32),
        grid=(1,),
        in_specs=[pl.BlockSpec((n, rows, c), lambda i: (0, 0, 0)),
                  pl.BlockSpec((1, 1, c), lambda i: (0, 0, 0)),
                  pl.BlockSpec((1, 1, c), lambda i: (0, 0, 0))],
        out_specs=pl.BlockSpec((n, c), lambda i: (0, 0)),
        compiler_params=pltpu.CompilerParams(
            dimension_semantics=("arbitrary",),
            vmem_limit_bytes=VMEM_LIMIT),
    )
    return jax.jit(call)


def final_pool(h, bn5):
    n, hh, ww, c = h.shape
    rows = hh * ww
    rows_pad = _round_up(rows, 8)
    x = h.reshape(n, rows, c)
    if rows_pad != rows:
        x = jnp.pad(x, ((0, 0), (0, rows_pad - rows), (0, 0)))
    s, t = bn5
    return _build_final_pool(n, rows_pad, c, rows)(
        x, s.reshape(1, 1, c), t.reshape(1, 1, c))


# --------------------------------------------------------------------------
# JAX glue: im2col for the cheap 7x7 stem only
# --------------------------------------------------------------------------

def extract_patches(x, k, stride, pad):
    n, h, w, c = x.shape
    xp = jnp.pad(x, ((0, 0), (pad, pad), (pad, pad), (0, 0)))
    ho = (h + 2 * pad - k) // stride + 1
    wo = (w + 2 * pad - k) // stride + 1
    views = []
    for di in range(k):
        for dj in range(k):
            v = lax.slice(xp, (0, di, dj, 0),
                          (n, di + (ho - 1) * stride + 1,
                           dj + (wo - 1) * stride + 1, c),
                          (1, stride, stride, 1))
            views.append(v)
    patches = jnp.stack(views, axis=3)                 # (n, ho, wo, k*k, c)
    return patches, ho, wo


# --------------------------------------------------------------------------
# Parameters (deterministic synthetic init — densenet121 + heads shapes)
# --------------------------------------------------------------------------

def init_params(key):
    keys = iter(jax.random.split(key, 1024))

    def nk():
        return next(keys)

    def conv_w(shape):
        fan_in = 1
        for d in shape[:-1]:
            fan_in *= d
        w = (2.0 / fan_in) ** 0.5 * jax.random.normal(nk(), shape, jnp.float32)
        return w.astype(jnp.bfloat16)

    def bn_fold(c):
        gamma = 1.0 + 0.1 * jax.random.normal(nk(), (c,), jnp.float32)
        beta = 0.1 * jax.random.normal(nk(), (c,), jnp.float32)
        mean = 0.1 * jax.random.normal(nk(), (c,), jnp.float32)
        var = 1.0 + 0.1 * jax.random.uniform(nk(), (c,), jnp.float32)
        scale = gamma / jnp.sqrt(var + BN_EPS)
        shift = beta - mean * scale
        return scale.reshape(1, c), shift.reshape(1, c)

    def linear(cin, cout):
        bound = (1.0 / cin) ** 0.5
        w = jax.random.uniform(nk(), (cin, cout), jnp.float32, -bound, bound)
        bias = jax.random.uniform(nk(), (1, cout), jnp.float32, -bound, bound)
        # bias applied through the matmul epilogue: out * 1 + bias
        return w.astype(jnp.bfloat16), (jnp.ones((1, cout), jnp.float32), bias)

    params = {
        "stem_w": conv_w((7, 7, 3, NUM_INIT_FEATURES)).reshape(
            7 * 7 * 3, NUM_INIT_FEATURES),
        "stem_bn": bn_fold(NUM_INIT_FEATURES),
    }
    c = NUM_INIT_FEATURES
    for b, nlayers in enumerate(BLOCK_CONFIG):
        for l in range(nlayers):
            cin = c + l * GROWTH
            params[f"b{b}l{l}"] = {
                "bn1": bn_fold(cin),
                "w1": conv_w((cin, BN_SIZE * GROWTH)),
                "bn2": bn_fold(BN_SIZE * GROWTH),
                "w2": conv_w((3, 3, BN_SIZE * GROWTH, GROWTH)),
            }
        c += nlayers * GROWTH
        if b != len(BLOCK_CONFIG) - 1:
            params[f"t{b}"] = {"bn": bn_fold(c), "w": conv_w((c, c // 2))}
            c //= 2
    params["bn5"] = bn_fold(c)                       # c == 1024
    params["img_fc"] = linear(c, EMB_DIMS)
    params["txt_fc1"] = linear(TEXT_IN, 64)
    params["txt_fc2"] = linear(64, 64)
    params["txt_fc3"] = linear(64, EMB_DIMS)
    params["cls"] = linear(EMB_DIMS, 14)
    return params


# --------------------------------------------------------------------------
# Forward pass
# --------------------------------------------------------------------------

def densenet_features(images_nchw, params):
    x = jnp.transpose(images_nchw, (0, 2, 3, 1)).astype(jnp.bfloat16)   # NHWC
    n = x.shape[0]

    # stem: 7x7/s2 conv as im2col matmul with BN0+ReLU fused as epilogue
    patches, ho, wo = extract_patches(x, 7, 2, 3)
    a = patches.reshape(n * ho * wo, 7 * 7 * 3)
    h = fused_matmul(a, params["stem_w"], post=params["stem_bn"], post_relu=True)
    h = h.reshape(n, ho, wo, NUM_INIT_FEATURES)
    h = max_pool_3x3_s2_p1(h)

    for b, nlayers in enumerate(BLOCK_CONFIG):
        hh, ww = h.shape[1], h.shape[2]
        for l in range(nlayers):
            p = params[f"b{b}l{l}"]
            cin = h.shape[3]
            # norm1+ReLU (prologue) -> 1x1 conv -> norm2+ReLU (epilogue): one kernel
            y = fused_matmul(h.reshape(n * hh * ww, cin), p["w1"],
                             pre=p["bn1"], post=p["bn2"], post_relu=True)
            # 3x3 growth conv, taps folded inside the kernel (no im2col in HBM)
            y = conv3x3(y.reshape(n, hh, ww, BN_SIZE * GROWTH), p["w2"])
            # TODO(synk): in-place channel growth (aliased output) is blocked by the
            # 128-lane minimum store width for a 32-channel slice; bf16 concat instead.
            h = jnp.concatenate([h, y], axis=-1)
        if b != len(BLOCK_CONFIG) - 1:
            p = params[f"t{b}"]
            cin = h.shape[3]
            t = fused_matmul(h.reshape(n * hh * ww, cin), p["w"], pre=p["bn"])
            h = avg_pool_2x2(t.reshape(n, hh, ww, cin // 2))

    # norm5 + ReLU + avg_pool2d(7) + flatten, fused in a single kernel -> (N, 1024)
    return final_pool(h, params["bn5"])


def image_branch(images, params):
    feats = densenet_features(images, params)
    w, post = params["img_fc"]
    return fused_matmul(feats.astype(jnp.bfloat16), w, post=post,
                        out_dtype=jnp.float32)


def text_branch(text, params):
    t = text.astype(jnp.bfloat16)
    for name in ("txt_fc1", "txt_fc2", "txt_fc3"):
        w, post = params[name]
        out_dtype = jnp.float32 if name == "txt_fc3" else jnp.bfloat16
        t = fused_matmul(t, w, post=post, post_relu=True, out_dtype=out_dtype)
    return t


def model_joint_forward(images, text, params):
    image_emb = image_branch(images, params)
    text_emb = text_branch(text, params)
    w, post = params["cls"]
    predictions = fused_matmul(image_emb.astype(jnp.bfloat16), w, post=post,
                               out_dtype=jnp.float32)
    return image_emb, text_emb, predictions


if __name__ == "__main__":
    key = jax.random.PRNGKey(0)
    pkey, ikey, tkey = jax.random.split(key, 3)
    params = init_params(pkey)
    # Smallest input consistent with densenet121.features + avg_pool2d(kernel_size=7):
    # the final feature map must be 7x7 -> spatial 224.  Text input dim fixed at 8919.
    images = jax.random.normal(ikey, (2, 3, 224, 224), jnp.float32)
    text = jax.random.normal(tkey, (2, TEXT_IN), jnp.float32)

    image_emb, text_emb, predictions = model_joint_forward(images, text, params)
    image_emb, text_emb, predictions = jax.block_until_ready(
        (image_emb, text_emb, predictions))

    assert image_emb.shape == (2, EMB_DIMS), image_emb.shape
    assert text_emb.shape == (2, EMB_DIMS), text_emb.shape
    assert predictions.shape == (2, 14), predictions.shape
    for o in (image_emb, text_emb, predictions):
        assert bool(jnp.all(jnp.isfinite(o)))
    print("KERNEL_OK")
</pallas_src>

<mosaic_0001>
module attributes {stable_mosaic.version = 11 : i64} {
  func.func @_mm_post_relu_kernel(%arg0: i32, %arg1: i32, %arg2: memref<512x256xbf16, #tpu.memory_space<vmem>>, %arg3: memref<256x64xbf16, #tpu.memory_space<vmem>>, %arg4: memref<1x64xf32, #tpu.memory_space<vmem>>, %arg5: memref<1x64xf32, #tpu.memory_space<vmem>>, %arg6: memref<512x64xbf16, #tpu.memory_space<vmem>>) attributes {dimension_semantics = [#tpu.dimension_semantics<parallel>, #tpu.dimension_semantics<parallel>], iteration_bounds = array<i64: 49, 1>, scalar_prefetch = 0 : i64, scratch_operands = 0 : i64, tpu.core_type = #tpu.core_type<tc>, window_params = [{transform_indices = @transform_0, window_bounds = array<i64: 512, 256>}, {transform_indices = @transform_1, window_bounds = array<i64: 256, 64>}, {transform_indices = @transform_2, window_bounds = array<i64: 1, 64>}, {transform_indices = @transform_3, window_bounds = array<i64: 1, 64>}, {transform_indices = @transform_4, window_bounds = array<i64: 512, 64>}]} {
    %c0 = arith.constant 0 : index
    %c0_0 = arith.constant 0 : index
    %0 = vector.load %arg2[%c0, %c0_0] : memref<512x256xbf16, #tpu.memory_space<vmem>>, vector<512x256xbf16>
    %c0_1 = arith.constant 0 : index
    %c0_2 = arith.constant 0 : index
    %1 = vector.load %arg3[%c0_1, %c0_2] : memref<256x64xbf16, #tpu.memory_space<vmem>>, vector<256x64xbf16>
    %cst = arith.constant dense<0.000000e+00> : vector<512x64xf32>
    %2 = tpu.matmul %0, %1, %cst {dimension_numbers = #tpu.dot_dimension_numbers<[1], [0], [0], [1], [0, 0, 1, 1], [], []>} : vector<512x256xbf16>, vector<256x64xbf16>, vector<512x64xf32> -> vector<512x64xf32>
    %c0_3 = arith.constant 0 : index
    %c0_4 = arith.constant 0 : index
    %3 = vector.load %arg4[%c0_3, %c0_4] : memref<1x64xf32, #tpu.memory_space<vmem>>, vector<1x64xf32>
    %4 = vector.broadcast %3 : vector<1x64xf32> to vector<512x64xf32>
    %5 = arith.mulf %2, %4 : vector<512x64xf32>
    %c0_5 = arith.constant 0 : index
    %c0_6 = arith.constant 0 : index
    %6 = vector.load %arg5[%c0_5, %c0_6] : memref<1x64xf32, #tpu.memory_space<vmem>>, vector<1x64xf32>
    %7 = vector.broadcast %6 : vector<1x64xf32> to vector<512x64xf32>
    %8 = arith.addf %5, %7 : vector<512x64xf32>
    %cst_7 = arith.constant 0.000000e+00 : f32
    %9 = vector.broadcast %cst_7 : f32 to vector<512x64xf32>
    %10 = arith.maximumf %8, %9 : vector<512x64xf32>
    %11 = arith.truncf %10 : vector<512x64xf32> to vector<512x64xbf16>
    %c0_8 = arith.constant 0 : index
    %c0_9 = arith.constant 0 : index
    %12 = vector.load %arg6[%c0_8, %c0_9] : memref<512x64xbf16, #tpu.memory_space<vmem>>, vector<512x64xbf16>
    tpu.vector_store %arg6[%c0_8, %c0_9], %11 {strides = array<i32>} : memref<512x64xbf16, #tpu.memory_space<vmem>>, vector<512x64xbf16>,
    return
  }
  func.func @transform_0(%arg0: i32, %arg1: i32) -> (i32, i32) {
    %c0_i32 = arith.constant 0 : i32
    %c0_i32_0 = arith.constant 0 : i32
    return %arg0, %c0_i32 : i32, i32
  }
  func.func @transform_1(%arg0: i32, %arg1: i32) -> (i32, i32) {
    %c0_i32 = arith.constant 0 : i32
    %c0_i32_0 = arith.constant 0 : i32
    return %c0_i32, %arg1 : i32, i32
  }
  func.func @transform_2(%arg0: i32, %arg1: i32) -> (i32, i32) {
    %c0_i32 = arith.constant 0 : i32
    %c0_i32_0 = arith.constant 0 : i32
    return %c0_i32, %arg1 : i32, i32
  }
  func.func @transform_3(%arg0: i32, %arg1: i32) -> (i32, i32) {
    %c0_i32 = arith.constant 0 : i32
    %c0_i32_0 = arith.constant 0 : i32
    return %c0_i32, %arg1 : i32, i32
  }
  func.func @transform_4(%arg0: i32, %arg1: i32) -> (i32, i32) {
    %c0_i32 = arith.constant 0 : i32
    return %arg0, %arg1 : i32, i32
  }
}

</mosaic_0001>

<bundles_post_ra>
// kernel: tpu_custom_call.1
= control target key start
LH: loop header
LB: loop body
LE: loop exit
PB: predicated region body
PF: predicated region fallthrough
CT: control target
= control target key end

     0   :  { %9 = vsyncpa [#allocation3], 0  ;;  %s2970_s0 = inlined_call_operand.hbm [shape: bf16[25088,256], index: 0, kind: input, shape index: {}]   ;;  %s2971_s1 = inlined_call_operand.vmem [shape: bf16[256,64], index: 1, kind: input, shape index: {}]   ;;  %s2972_s2 = inlined_call_operand.hbm [shape: f32[1,64], index: 2, kind: input, shape index: {}]   ;;  %s2973_s3 = inlined_call_operand.hbm [shape: f32[1,64], index: 3, kind: input, shape index: {}]   ;;  %s2974_s4 = inlined_call_operand.vmem [shape: bf16[25088,64], index: 4, kind: output, shape index: {}]  }
   0x1   :  { %11 = vsyncpa [#allocation3 + $0x1], 0 }
   0x2   :  { %12 = vsyncpa [#allocation5], 0  ;;  %s2377_s15 = smov 0   ;;  %s2379_s16 = smov 0  }
   0x3   :  { %s2381_s17 = smov 0   ;;  %s2383_s18 = smov 0  }
   0x4   :  { %s2385_s19 = smov 0   ;;  %s2387_s20 = smov 0  }
   0x5 LB: > { %s1750_s21 = sadd.s32 4294967295, %s2344_s20   ;;  %s37_s22 = sadd.s32 1, %s2332_s17  ;;  %s2344_s20 = sphi %s2387_s20, %s18_s20   ;;  %s2340_s19 = sphi %s2385_s19, %s2993_s19   ;;  %s2336_s18 = sphi %s2383_s18, %s2992_s18   ;;  %s2332_s17 = sphi %s2381_s17, %s2991_s17   ;;  %s2328_s16 = sphi %s2379_s16, %s2990_s16   ;;  %s2324_s15 = sphi %s2377_s15, %s2989_s15  }
   0x6   : > { %p44_p0 = scmp.ne.s32.totalorder %s2332_s17, %s2328_s16  ;;  %p45_p1 = scmp.eq.s32.totalorder %s2344_s20, 0 }
   0x7   : > { %p50_p2 = scmp.ne.s32.totalorder %s2328_s16, %s2324_s15  ;;  %p2411_p3 = scmp.eq.s32.totalorder %s1750_s21, 0 }
   0x8   : > { %p46_p4 = por %p45_p1, %p44_p0  ;;  %p1752_p5 = scmp.ge.s32.totalorder %s2344_s20, 1 }
   0x9   : > { %s2980_s23 = scalar_select %p2411_p3, 1, 0 }
   0xa   : > { %p2418_p6 = por %p2411_p3, %p50_p2  ;;  %p167_p7 = scmp.lt.s32.totalorder %s2344_s20, 50 }
   0xb   : > { %s2346_s26 = smov [#allocation4]   ;;  %p2036_p10 = scmp.lt.s32.totalorder %s2344_s20, 49 }
   0xc   : > { %s2981_s24 = scalar_select %p2418_p6, 1, 0 }
   0xd   : > { %p2423_p8 = pnand %p1752_p5, %p167_p7  ;;  %s189_s27 = sshll.u32 %s2346_s26, 4  ;;  %s190_s27 = int_to_ptr.vmem [resolvable:$true] %s189_s27 }
   0xe   : > { %p2436_p12 = pnand %p2036_p10, %p46_p4  ;;  %s2347_s30 = smov [#allocation6]  }
   0xf   : > { %s2982_s25 = scalar_select %p2423_p8, 1, 0 }
  0x10   : > { %p2023_p9 = pneg %p2423_p8  ;;  %s202_s5 = sshll.u32 %s2347_s30, 4  ;;  %s203_s5 = int_to_ptr.vmem [resolvable:$true] %s202_s5 }
  0x11   : > { %s2984_s29 = scalar_select %p2436_p12, 1, 0 }
  0x12   : > { %p2432_p11 = pnand %p2023_p9, %p2411_p3  ;;  %s2204_s8 = scalar_lea.hbm %s2972_s2, 16 }
  0x13   : > { %p2205_p13 = scmp.ne.s32.totalorder %s2972_s2, %s2204_s8  ;;  %p2211_p4 = scmp.lt.u32.totalorder %s2204_s8, %s2972_s2 }
  0x14   : > { %p2206_p0 = pneg %p2432_p11 }
  0x16   : > { %p2207_p1 = pnand %p2206_p0, %p2205_p13 }
  0x18   : > { %p2208_p2 = pneg %p2207_p1 }
  0x1a   : > { %p2213_p5 = pnand %p2211_p4, %p2208_p2 }
  0x1c   : > { %2216 = shalt.err (!%p2213_p5)
}
  0x1d   : > { %s2217_s13 = scalar_lea.vmem %s190_s27, 16  ;;  %s2224_s14 = scalar_lea.vmem %s190_s27, 32 }
  0x1e   : > { %p2218_p7 = scmp.ne.s32.totalorder %s190_s27, %s2217_s13  ;;  %p2225_p3 = scmp.lt.s32.totalorder %s190_s27, %s190_s27 }
  0x1f   : > { %p2226_p6 = scmp.lt.s32.totalorder %s2224_s14, %s2217_s13 }
  0x20   : > { %p2220_p9 = pnand %p2218_p7, %p2206_p0 }
  0x21   : > { %p2227_p8 = por %p2226_p6, %p2225_p3 }
  0x22   : > { %p2221_p10 = pneg %p2220_p9 }
  0x24   : > { %p2228_p12 = pnand %p2227_p8, %p2221_p10 }
  0x26   : > { %2231 = shalt.err (!%p2228_p12)
}
  0x27   : > { %2026 = dma.hbm_to_vmem [thread:$0]  (!%p2432_p11), %s2972_s2, 16, %s190_s27, [#allocation5]  }
  0x28   : > { %s30_s26 = sadd.s32 1, %s2340_s19  ;;  %s2232_s7 = scalar_lea.hbm %s2973_s3, 16 }
  0x29   : > { %p2233_p3 = scmp.ne.s32.totalorder %s2973_s3, %s2232_s7  ;;  %p2239_p12 = scmp.lt.u32.totalorder %s2232_s7, %s2973_s3 }
  0x2b   : > { %p2235_p6 = pnand %p2233_p3, %p2206_p0 }
  0x2d   : > { %p2236_p8 = pneg %p2235_p6 }
  0x2f   : > { %p2241_p13 = pnand %p2239_p12, %p2236_p8 }
  0x31   : > { %2244 = shalt.err (!%p2241_p13)
}
  0x32   : > { %s2245_s27 = scalar_lea.vmem %s203_s5, 16  ;;  %s2252_s12 = scalar_lea.vmem %s203_s5, 32 }
  0x33   : > { %p2246_p1 = scmp.ne.s32.totalorder %s203_s5, %s2245_s27  ;;  %p2253_p5 = scmp.lt.s32.totalorder %s203_s5, %s203_s5 }
  0x34   : > { %p2254_p7 = scmp.lt.s32.totalorder %s2252_s12, %s2245_s27 }
  0x35   : > { %p2248_p2 = pnand %p2246_p1, %p2206_p0 }
  0x36   : > { %p2255_p9 = por %p2254_p7, %p2253_p5 }
  0x37   : > { %p2249_p4 = pneg %p2248_p2 }
  0x39   : > { %p2256_p10 = pnand %p2255_p9, %p2249_p4 }
  0x3b   : > { %2259 = shalt.err (!%p2256_p10)
}
  0x3c   : > { %2029 = dma.hbm_to_vmem [thread:$0]  (!%p2432_p11), %s2973_s3, 16, %s203_s5, [#allocation5]  }
  0x3d   : > { %p32_p0 = scmp.ge.s32.totalorder %s30_s26, 49  ;;  %s213_s15 = sand.u32 1, %s2332_s17  }
  0x3e   : > { %s1757_s21 = sshll.u32 %s213_s15, 9  ;;  %s1916_s30 = sshll.u32 %s2340_s19, 13 }
  0x3f   : > { %s2995_s26 = smov (%p32_p0, %s30_s26), 0  ;;  %s2492_s8 = scalar_lea.hbm %s2970_s0, %s1916_s30 }
  0x40   : > { %s34_s6 = ssub.s32 %s2340_s19, %s2995_s26  ;;  %s217_s5 = scalar_lea.vmem [#allocation2], %s1757_s21 }
  0x41   : > { %p35_p11 = scmp.eq.s32.totalorder %s34_s6, 0  ;;  %s225_s9 = sshll.u32 %s217_s5, 4  ;;  %s2494_s9 = int_to_ptr.vmem [resolvable:$true] %s225_s9 }
  0x42   : > { %s2501_s11 = scalar_lea.sflag [#allocation3], %s213_s15  ;;  %s2260_s27 = scalar_lea.hbm %s2492_s8, 8192 }
  0x43   : > { %s2499_s10 = scalar_select %p35_p11, %s2332_s17, %s37_s22  }
  0x44   : > { %p2261_p3 = scmp.ne.s32.totalorder %s2492_s8, %s2260_s27  ;;  %p2985_p6 = scmp.ne.s32.totalorder %s2984_s29, 0 }
  0x45   : > { %s2265_s14 = scalar_lea.hbm %s2970_s0, 401408  ;;  %p2266_p1 = scmp.lt.u32.totalorder %s2492_s8, %s2970_s0 }
  0x46   : > { %p2262_p8 = pneg %p2985_p6  ;;  %p2267_p2 = scmp.lt.u32.totalorder %s2265_s14, %s2260_s27 }
  0x47   : > { %p2269_p5 = scmp.lt.u32.totalorder %s2260_s27, %s2492_s8 }
  0x48   : > { %p2263_p12 = pnand %p2262_p8, %p2261_p3  ;;  %p2268_p4 = por %p2267_p2, %p2266_p1 }
  0x4a   : > { %p2264_p13 = pneg %p2263_p12  ;;  %p2270_p7 = por %p2269_p5, %p2268_p4 }
  0x4c   : > { %p2271_p9 = pnand %p2270_p7, %p2264_p13 }
  0x4e   : > { %2274 = shalt.err (!%p2271_p9)
}
  0x4f   : > { %s2275_s22 = scalar_lea.vmem %s2494_s9, 8192  ;;  %s2348_s15 = smov [#allocation2]  }
  0x50   : > { %p2276_p10 = scmp.ne.s32.totalorder %s2494_s9, %s2275_s22  ;;  %s2280_s6 = sshll.u32 %s2348_s15, 4  ;;  %s2281_s6 = int_to_ptr.vmem [resolvable:$false] %s2280_s6 }
  0x51   : > { %s2282_s28 = scalar_lea.vmem %s2281_s6, 16384  ;;  %p2283_p3 = scmp.lt.s32.totalorder %s2494_s9, %s2281_s6 }
  0x52   : > { %p2278_p0 = pnand %p2276_p10, %p2262_p8  ;;  %p2284_p12 = scmp.lt.s32.totalorder %s2282_s28, %s2275_s22 }
  0x54   : > { %p2279_p11 = pneg %p2278_p0  ;;  %p2285_p1 = por %p2284_p12, %p2283_p3 }
  0x56   : > { %p2286_p2 = pnand %p2285_p1, %p2279_p11 }
  0x58   : > { %2289 = shalt.err (!%p2286_p2)
}
  0x59   : > { %s2349_s7 = smov 128   ;;  %s2350_s5 = smov 8  }
  0x5a   : > { %2033 = dma.hbm_to_vmem [thread:$0]  (!%p2985_p6), %s2492_s8, 8192, %s2494_s9, %s2501_s11, %s2349_s7, %s2349_s7, %s2350_s5  }
  0x5b   : > { %p2986_p8 = scmp.ne.s32.totalorder %s2982_s25, 0 }
  0x5c   : > { %s239_s27 = sand.u32 (!%p2986_p8), 1, %s2328_s16   ;;  %p2987_p13 = scmp.ne.s32.totalorder (!%p2986_p8), %s2981_s24, 0 }
  0x5d   : > { %237 = sbr.rel (%p2986_p8) target bundleno = 512 (0x200), region = 36  ;;  %s1762_s12 = sshll.u32 (!%p2986_p8), %s239_s27, 9 }
  0x5e   : > { %s240_s13 = scalar_lea.sflag (!%p2986_p8), [#allocation3], %s239_s27  ;;  %s2532_s14 = scalar_lea.vmem (!%p2986_p8), [#allocation2], %s1762_s12 }
  0x64   : > { %2315 = dma.done.wait (%p2987_p13), %s240_s13, 8192  }
  0x65   : > { %2317 = vsyncadd (%p2987_p13), %s240_s13, 4294959104  ;;  %p2988_p4 = scmp.ne.s32.totalorder %s2980_s23, 0 }
  0x67   : > { %2319 = dma.done.wait (%p2988_p4), [#allocation5], 32  }
  0x68   : > { %2321 = vsyncadd (%p2988_p4), [#allocation5], 4294967264  ;;  %v2351_v0 = vmov 0   ;;  %v2092_v1 = vld [vmem:[%s2971_s1] sm:$0xff]   ;;  %v2093_v2 = vld [vmem:[%s2971_s1 + $0x8] sm:$0xff]   ;;  %s1765_s5 = sshll.u32 %s2336_s18, 6 }
  0x69   : > { %810 = vmatprep.subr.bf16.mxu0 %v2351_v0  ;;  %1981 = vmatprep.subr.bf16.mxu1 %v2351_v0  ;;  %v2094_v3 = vld [vmem:[%s2971_s1 + $0x10] sm:$0xff]   ;;  %v2095_v4 = vld [vmem:[%s2971_s1 + $0x18] sm:$0xff]   ;;  %v2096_v5 = vld [vmem:[%s2971_s1 + $0x20] sm:$0xff]   ;;  %p289_p6 = scmp.lt.s32.totalorder %s1765_s5, 3135  ;;  %vm1561_vm0 = vcmask 519168  }
  0x6a   : > { %811 = vmatpush1.bf16.msra.mxu0 %v2092_v1  ;;  %1997 = vmatpush1.bf16.msra.mxu1 %v2092_v1  ;;  %v2110_v6 = vld [vmem:[%s2532_s14 + $0x4] ss:$8 sps:$4 sm:$0xff]   ;;  %v2098_v9 = vld [vmem:[%s2971_s1 + $0x30] sm:$0xff]   ;;  %v2099_v10 = vld [vmem:[%s2971_s1 + $0x38] sm:$0xff]  }
  0x6b   : > { %812 = vmatprep.subr.bf16.mxu0 %v2351_v0  ;;  %1982 = vmatprep.subr.bf16.mxu1 %v2351_v0  ;;  %v2097_v7 = vld [vmem:[%s2971_s1 + $0x28] sm:$0xff]   ;;  %v2100_v11 = vld [vmem:[%s2971_s1 + $0x40] sm:$0xff]   ;;  %v2102_v13 = vld [vmem:[%s2971_s1 + $0x50] sm:$0xff]   ;;  %s2997_s5 = smov (!%p289_p6, %s1765_s5), 3135 }
  0x6c   : > { %v2113_v8 = vld [vmem:[%s2532_s14 + $0x104] ss:$8 sps:$4 sm:$0xff]   ;;  %842 = vmatprep.mubr.bf16.mxu0 %v2110_v6  ;;  %v2103_v14 = vld [vmem:[%s2971_s1 + $0x58] sm:$0xff]   ;;  %v2106_v17 = vld [vmem:[%s2971_s1 + $0x70] sm:$0xff]  }
  0x6d   : > { %970 = vmatprep.mubr.bf16.mxu1 %v2113_v8  ;;  %v2101_v12 = vld [vmem:[%s2971_s1 + $0x48] sm:$0xff]   ;;  %v2104_v15 = vld [vmem:[%s2971_s1 + $0x60] sm:$0xff]   ;;  %v2107_v18 = vld [vmem:[%s2971_s1 + $0x78] sm:$0xff]  }
  0x6e   : > { %813 = vmatpush1.bf16.msra.mxu0 %v2093_v2  ;;  %1998 = vmatpush1.bf16.msra.mxu1 %v2093_v2  ;;  %v2105_v16 = vld [vmem:[%s2971_s1 + $0x68] sm:$0xff]   ;;  %v2114_v21 = vld [vmem:[%s2532_s14 + $0x14] ss:$8 sps:$4 sm:$0xff]   ;;  %v2118_v23 = vld [vmem:[%s2532_s14 + $0x10] ss:$8 sps:$4 sm:$0xff]  }
  0x6f   : > { %814 = vmatprep.subr.bf16.mxu0 %v2351_v0  ;;  %1983 = vmatprep.subr.bf16.mxu1 %v2351_v0  ;;  %v2108_v19 = vld [vmem:[%s2532_s14] ss:$8 sps:$4 sm:$0xff]   ;;  %v2116_v22 = vld [vmem:[%s2532_s14 + $0x114] ss:$8 sps:$4 sm:$0xff]   ;;  %v2119_v24 = vld [vmem:[%s2532_s14 + $0x110] ss:$8 sps:$4 sm:$0xff]  }
  0x70   : > { %v2111_v20 = vld [vmem:[%s2532_s14 + $0x100] ss:$8 sps:$4 sm:$0xff]   ;;  %v2120_v25 = vld [vmem:[%s2532_s14 + $0x24] ss:$8 sps:$4 sm:$0xff]   ;;  %v2126_v29 = vld [vmem:[%s2532_s14 + $0x34] ss:$8 sps:$4 sm:$0xff]  }
  0x71   : > { %v2122_v26 = vld [vmem:[%s2532_s14 + $0x124] ss:$8 sps:$4 sm:$0xff]   ;;  %v2124_v27 = vld [vmem:[%s2532_s14 + $0x20] ss:$8 sps:$4 sm:$0xff]   ;;  %v2128_v30 = vld [vmem:[%s2532_s14 + $0x134] ss:$8 sps:$4 sm:$0xff]  }
  0x72   : > { %815 = vmatpush1.bf16.msra.mxu0 %v2094_v3  ;;  %1999 = vmatpush1.bf16.msra.mxu1 %v2094_v3  ;;  %v2125_v28 = vld [vmem:[%s2532_s14 + $0x120] ss:$8 sps:$4 sm:$0xff]   ;;  %v2130_v31 = vld [vmem:[%s2532_s14 + $0x30] ss:$8 sps:$4 sm:$0xff]   ;;  %v2132_v33 = vld [vmem:[%s2532_s14 + $0x44] ss:$8 sps:$4 sm:$0xff]  }
  0x73   : > { %816 = vmatprep.subr.bf16.mxu0 %v2351_v0  ;;  %1984 = vmatprep.subr.bf16.mxu1 %v2351_v0  ;;  %v2131_v32 = vld [vmem:[%s2532_s14 + $0x130] ss:$8 sps:$4 sm:$0xff]   ;;  %v2134_v34 = vld [vmem:[%s2532_s14 + $0x144] ss:$8 sps:$4 sm:$0xff]   ;;  %v2136_v35 = vld [vmem:[%s2532_s14 + $0x40] ss:$8 sps:$4 sm:$0xff]  }
  0x74   : > { %v2137_v36 = vld [vmem:[%s2532_s14 + $0x140] ss:$8 sps:$4 sm:$0xff]   ;;  %v2138_v37 = vld [vmem:[%s2532_s14 + $0x54] ss:$8 sps:$4 sm:$0xff]   ;;  %v2142_v39 = vld [vmem:[%s2532_s14 + $0x50] ss:$8 sps:$4 sm:$0xff]  }
  0x75   : > { %v2140_v38 = vld [vmem:[%s2532_s14 + $0x154] ss:$8 sps:$4 sm:$0xff]   ;;  %v2143_v40 = vld [vmem:[%s2532_s14 + $0x150] ss:$8 sps:$4 sm:$0xff]   ;;  %v2144_v41 = vld [vmem:[%s2532_s14 + $0x64] ss:$8 sps:$4 sm:$0xff]  }
  0x76   : > { %817 = vmatpush1.bf16.msra.mxu0 %v2095_v4  ;;  %2000 = vmatpush1.bf16.msra.mxu1 %v2095_v4  ;;  %v2146_v42 = vld [vmem:[%s2532_s14 + $0x164] ss:$8 sps:$4 sm:$0xff]   ;;  %v2148_v43 = vld [vmem:[%s2532_s14 + $0x60] ss:$8 sps:$4 sm:$0xff]   ;;  %v2150_v45 = vld [vmem:[%s2532_s14 + $0x74] ss:$8 sps:$4 sm:$0xff]  }
  0x77   : > { %818 = vmatprep.subr.bf16.mxu0 %v2351_v0  ;;  %1985 = vmatprep.subr.bf16.mxu1 %v2351_v0  ;;  %v2149_v44 = vld [vmem:[%s2532_s14 + $0x160] ss:$8 sps:$4 sm:$0xff]   ;;  %v2152_v46 = vld [vmem:[%s2532_s14 + $0x174] ss:$8 sps:$4 sm:$0xff]   ;;  %v2154_v47 = vld [vmem:[%s2532_s14 + $0x70] ss:$8 sps:$4 sm:$0xff]  }
  0x78   : > { %v2155_v48 = vld [vmem:[%s2532_s14 + $0x170] ss:$8 sps:$4 sm:$0xff]   ;;  %v2156_v49 = vld [vmem:[%s2532_s14 + $0x84] ss:$8 sps:$4 sm:$0xff]   ;;  %v2160_v51 = vld [vmem:[%s2532_s14 + $0x80] ss:$8 sps:$4 sm:$0xff]  }
  0x79   : > { %v2158_v50 = vld [vmem:[%s2532_s14 + $0x184] ss:$8 sps:$4 sm:$0xff]   ;;  %v2161_v52 = vld [vmem:[%s2532_s14 + $0x180] ss:$8 sps:$4 sm:$0xff]   ;;  %v2162_v53 = vld [vmem:[%s2532_s14 + $0x94] ss:$8 sps:$4 sm:$0xff]  }
  0x7a   : > { %819 = vmatpush1.bf16.msra.mxu0 %v2096_v5  ;;  %2001 = vmatpush1.bf16.msra.mxu1 %v2096_v5  ;;  %v2164_v54 = vld [vmem:[%s2532_s14 + $0x194] ss:$8 sps:$4 sm:$0xff]   ;;  %v2166_v55 = vld [vmem:[%s2532_s14 + $0x90] ss:$8 sps:$4 sm:$0xff]   ;;  %v2168_v57 = vld [vmem:[%s2532_s14 + $0xa4] ss:$8 sps:$4 sm:$0xff]  }
  0x7b   : > { %820 = vmatprep.subr.bf16.mxu0 %v2351_v0  ;;  %1986 = vmatprep.subr.bf16.mxu1 %v2351_v0  ;;  %v2167_v56 = vld [vmem:[%s2532_s14 + $0x190] ss:$8 sps:$4 sm:$0xff]   ;;  %v2170_v58 = vld [vmem:[%s2532_s14 + $0x1a4] ss:$8 sps:$4 sm:$0xff]   ;;  %v2172_v59 = vld [vmem:[%s2532_s14 + $0xa0] ss:$8 sps:$4 sm:$0xff]  }
  0x7c   : > { %v2173_v60 = vld [vmem:[%s2532_s14 + $0x1a0] ss:$8 sps:$4 sm:$0xff]   ;;  %v2174_v61 = vld [vmem:[%s2532_s14 + $0xb4] ss:$8 sps:$4 sm:$0xff]   ;;  %v2178_v63 = vld [vmem:[%s2532_s14 + $0xb0] ss:$8 sps:$4 sm:$0xff]  }
  0x7d   : > { %v2176_v62 = vld [vmem:[%s2532_s14 + $0x1b4] ss:$8 sps:$4 sm:$0xff]   ;;  %v2180_v1 = vld [vmem:[%s2532_s14 + $0xc4] ss:$8 sps:$4 sm:$0xff]   ;;  %v2184_v3 = vld [vmem:[%s2532_s14 + $0xc0] ss:$8 sps:$4 sm:$0xff]  }
  0x7e   : > { %821 = vmatpush1.bf16.msra.mxu0 %v2097_v7  ;;  %2002 = vmatpush1.bf16.msra.mxu1 %v2097_v7  ;;  %v2182_v2 = vld [vmem:[%s2532_s14 + $0x1c4] ss:$8 sps:$4 sm:$0xff]   ;;  %v2185_v4 = vld [vmem:[%s2532_s14 + $0x1c0] ss:$8 sps:$4 sm:$0xff]   ;;  %v2186_v5 = vld [vmem:[%s2532_s14 + $0xd4] ss:$8 sps:$4 sm:$0xff]  }
  0x7f   : > { %822 = vmatprep.subr.bf16.mxu0 %v2351_v0  ;;  %1987 = vmatprep.subr.bf16.mxu1 %v2351_v0  ;;  %v2188_v6 = vld [vmem:[%s2532_s14 + $0x1d4] ss:$8 sps:$4 sm:$0xff]   ;;  %v2190_v7 = vld [vmem:[%s2532_s14 + $0xd0] ss:$8 sps:$4 sm:$0xff]  }
  0x80   : > { %v2191_v8 = vld [vmem:[%s2532_s14 + $0x1d0] ss:$8 sps:$4 sm:$0xff]  }
  0x82   : > { %823 = vmatpush1.bf16.msra.mxu0 %v2098_v9  ;;  %2003 = vmatpush1.bf16.msra.mxu1 %v2098_v9  ;;  %v2192_v9 = vld [vmem:[%s2532_s14 + $0xe4] ss:$8 sps:$4 sm:$0xff]  }
  0x83   : > { %824 = vmatprep.subr.bf16.mxu0 %v2351_v0  ;;  %1988 = vmatprep.subr.bf16.mxu1 %v2351_v0 }
  0x86   : > { %825 = vmatpush1.bf16.msra.mxu0 %v2099_v10  ;;  %2004 = vmatpush1.bf16.msra.mxu1 %v2099_v10  ;;  %v2194_v10 = vld [vmem:[%s2532_s14 + $0x1e4] ss:$8 sps:$4 sm:$0xff]  }
  0x87   : > { %826 = vmatprep.subr.bf16.mxu0 %v2351_v0  ;;  %1989 = vmatprep.subr.bf16.mxu1 %v2351_v0 }
  0x8a   : > { %827 = vmatpush1.bf16.msra.mxu0 %v2100_v11  ;;  %2005 = vmatpush1.bf16.msra.mxu1 %v2100_v11  ;;  %v2196_v11 = vld [vmem:[%s2532_s14 + $0xe0] ss:$8 sps:$4 sm:$0xff]  }
  0x8b   : > { %828 = vmatprep.subr.bf16.mxu0 %v2351_v0  ;;  %1990 = vmatprep.subr.bf16.mxu1 %v2351_v0 }
  0x8e   : > { %829 = vmatpush1.bf16.msra.mxu0 %v2101_v12  ;;  %2006 = vmatpush1.bf16.msra.mxu1 %v2101_v12  ;;  %v2197_v12 = vld [vmem:[%s2532_s14 + $0x1e0] ss:$8 sps:$4 sm:$0xff]  }
  0x8f   : > { %830 = vmatprep.subr.bf16.mxu0 %v2351_v0  ;;  %1991 = vmatprep.subr.bf16.mxu1 %v2351_v0 }
  0x92   : > { %831 = vmatpush1.bf16.msra.mxu0 %v2102_v13  ;;  %2007 = vmatpush1.bf16.msra.mxu1 %v2102_v13  ;;  %v2198_v13 = vld [vmem:[%s2532_s14 + $0xf4] ss:$8 sps:$4 sm:$0xff]  }
  0x93   : > { %832 = vmatprep.subr.bf16.mxu0 %v2351_v0  ;;  %1992 = vmatprep.subr.bf16.mxu1 %v2351_v0 }
  0x96   : > { %833 = vmatpush1.bf16.msra.mxu0 %v2103_v14  ;;  %2008 = vmatpush1.bf16.msra.mxu1 %v2103_v14  ;;  %v2200_v14 = vld [vmem:[%s2532_s14 + $0x1f4] ss:$8 sps:$4 sm:$0xff]  }
  0x97   : > { %834 = vmatprep.subr.bf16.mxu0 %v2351_v0  ;;  %1993 = vmatprep.subr.bf16.mxu1 %v2351_v0 }
  0x9a   : > { %835 = vmatpush1.bf16.msra.mxu0 %v2104_v15  ;;  %2009 = vmatpush1.bf16.msra.mxu1 %v2104_v15  ;;  %v2202_v15 = vld [vmem:[%s2532_s14 + $0xf0] ss:$8 sps:$4 sm:$0xff]  }
  0x9b   : > { %836 = vmatprep.subr.bf16.mxu0 %v2351_v0  ;;  %1994 = vmatprep.subr.bf16.mxu1 %v2351_v0 }
  0x9e   : > { %837 = vmatpush1.bf16.msra.mxu0 %v2105_v16  ;;  %2010 = vmatpush1.bf16.msra.mxu1 %v2105_v16  ;;  %v2203_v16 = vld [vmem:[%s2532_s14 + $0x1f0] ss:$8 sps:$4 sm:$0xff]  }
  0x9f   : > { %838 = vmatprep.subr.bf16.mxu0 %v2351_v0  ;;  %1995 = vmatprep.subr.bf16.mxu1 %v2351_v0 }
  0xa2   : > { %839 = vmatpush1.bf16.msra.mxu0 %v2106_v17  ;;  %2011 = vmatpush1.bf16.msra.mxu1 %v2106_v17  ;;  %v2687_v17 = vld [vmem:[#allocation4] ss:$0 sm:$0xff] }
  0xa3   : > { %840 = vmatprep.subr.bf16.mxu0 %v2351_v0  ;;  %1996 = vmatprep.subr.bf16.mxu1 %v2351_v0  ;;  %v2179_v0 = vld [vmem:[%s2532_s14 + $0x1b0] ss:$8 sps:$4 sm:$0xff]   ;;  %s1766_s14 = sshll.u32 %s2997_s5, 2 }
  0xa4   : > { %s2702_s12 = scalar_lea.vmem %s2974_s4, %s1766_s14 }
  0xa6   : > { %841 = vmatpush1.bf16.msra.mxu0 %v2107_v18  ;;  %2012 = vmatpush1.bf16.msra.mxu1 %v2107_v18 }
  0xa9   : > { %843 = vmatmul.mubr.bf16.vlgmr.msra.gmra.mrb[0].mxu0 %v2108_v19  ;;  %971 = vmatmul.mubr.bf16.vlgmr.msra.gmra.mrb[0].mxu1 %v2111_v20  ;;  %v2689_v19 = vld [vmem:[#allocation6] ss:$0 sm:$0xff] }
  0xaa   : > { %850 = vmatprep.mubr.bf16.mxu0 %v2114_v21  ;;  %978 = vmatprep.mubr.bf16.mxu1 %v2116_v22 }
  0xb1   : > { %851 = vmatmul.mubr.bf16.gmra.mrb[4].mxu0 %v2118_v23  ;;  %979 = vmatmul.mubr.bf16.gmra.mrb[4].mxu1 %v2119_v24 }
  0xb2   : > { %858 = vmatprep.mubr.bf16.mxu0 %v2120_v25  ;;  %986 = vmatprep.mubr.bf16.mxu1 %v2122_v26 }
  0xb9   : > { %859 = vmatmul.mubr.bf16.gmra.mrb[8].mxu0 %v2124_v27  ;;  %987 = vmatmul.mubr.bf16.gmra.mrb[8].mxu1 %v2125_v28 }
  0xba   : > { %866 = vmatprep.mubr.bf16.mxu0 %v2126_v29  ;;  %994 = vmatprep.mubr.bf16.mxu1 %v2128_v30 }
  0xc1   : > { %867 = vmatmul.mubr.bf16.gmra.mrb[12].mxu0 %v2130_v31  ;;  %995 = vmatmul.mubr.bf16.gmra.mrb[12].mxu1 %v2131_v32 }
  0xc2   : > { %874 = vmatprep.mubr.bf16.mxu0 %v2132_v33  ;;  %1002 = vmatprep.mubr.bf16.mxu1 %v2134_v34 }
  0xc9   : > { %875 = vmatmul.mubr.bf16.gmra.mrb[16].mxu0 %v2136_v35  ;;  %1003 = vmatmul.mubr.bf16.gmra.mrb[16].mxu1 %v2137_v36 }
  0xca   : > { %882 = vmatprep.mubr.bf16.mxu0 %v2138_v37  ;;  %1010 = vmatprep.mubr.bf16.mxu1 %v2140_v38 }
  0xd1   : > { %883 = vmatmul.mubr.bf16.gmra.mrb[20].mxu0 %v2142_v39  ;;  %1011 = vmatmul.mubr.bf16.gmra.mrb[20].mxu1 %v2143_v40 }
  0xd2   : > { %890 = vmatprep.mubr.bf16.mxu0 %v2144_v41  ;;  %1018 = vmatprep.mubr.bf16.mxu1 %v2146_v42 }
  0xd9   : > { %891 = vmatmul.mubr.bf16.gmra.mrb[24].mxu0 %v2148_v43  ;;  %1019 = vmatmul.mubr.bf16.gmra.mrb[24].mxu1 %v2149_v44 }
  0xda   : > { %898 = vmatprep.mubr.bf16.mxu0 %v2150_v45  ;;  %1026 = vmatprep.mubr.bf16.mxu1 %v2152_v46 }
  0xe1   : > { %899 = vmatmul.mubr.bf16.gmra.mrb[28].mxu0 %v2154_v47  ;;  %1027 = vmatmul.mubr.bf16.gmra.mrb[28].mxu1 %v2155_v48 }
  0xe2   : > { %906 = vmatprep.mubr.bf16.mxu0 %v2156_v49  ;;  %1034 = vmatprep.mubr.bf16.mxu1 %v2158_v50 }
  0xe9   : > { %907 = vmatmul.mubr.bf16.gmra.mrb[32].mxu0 %v2160_v51  ;;  %1035 = vmatmul.mubr.bf16.gmra.mrb[32].mxu1 %v2161_v52 }
  0xea   : > { %914 = vmatprep.mubr.bf16.mxu0 %v2162_v53  ;;  %1042 = vmatprep.mubr.bf16.mxu1 %v2164_v54 }
  0xf1   : > { %915 = vmatmul.mubr.bf16.gmra.mrb[36].mxu0 %v2166_v55  ;;  %1043 = vmatmul.mubr.bf16.gmra.mrb[36].mxu1 %v2167_v56 }
  0xf2   : > { %922 = vmatprep.mubr.bf16.mxu0 %v2168_v57  ;;  %1050 = vmatprep.mubr.bf16.mxu1 %v2170_v58 }
  0xf9   : > { %923 = vmatmul.mubr.bf16.gmra.mrb[40].mxu0 %v2172_v59  ;;  %1051 = vmatmul.mubr.bf16.gmra.mrb[40].mxu1 %v2173_v60 }
  0xfa   : > { %930 = vmatprep.mubr.bf16.mxu0 %v2174_v61  ;;  %1058 = vmatprep.mubr.bf16.mxu1 %v2176_v62 }
 0x101   : > { %931 = vmatmul.mubr.bf16.gmra.mrb[44].mxu0 %v2178_v63  ;;  %1059 = vmatmul.mubr.bf16.gmra.mrb[44].mxu1 %v2179_v0 }
 0x102   : > { %938 = vmatprep.mubr.bf16.mxu0 %v2180_v1  ;;  %1066 = vmatprep.mubr.bf16.mxu1 %v2182_v2 }
 0x109   : > { %939 = vmatmul.mubr.bf16.gmra.mrb[48].mxu0 %v2184_v3  ;;  %1067 = vmatmul.mubr.bf16.gmra.mrb[48].mxu1 %v2185_v4 }
 0x10a   : > { %946 = vmatprep.mubr.bf16.mxu0 %v2186_v5  ;;  %1074 = vmatprep.mubr.bf16.mxu1 %v2188_v6 }
 0x111   : > { %947 = vmatmul.mubr.bf16.gmra.mrb[52].mxu0 %v2190_v7  ;;  %1075 = vmatmul.mubr.bf16.gmra.mrb[52].mxu1 %v2191_v8 }
 0x112   : > { %954 = vmatprep.mubr.bf16.mxu0 %v2192_v9  ;;  %1082 = vmatprep.mubr.bf16.mxu1 %v2194_v10 }
 0x119   : > { %955 = vmatmul.mubr.bf16.gmra.mrb[56].mxu0 %v2196_v11  ;;  %1083 = vmatmul.mubr.bf16.gmra.mrb[56].mxu1 %v2197_v12 }
 0x11a   : > { %962 = vmatprep.mubr.bf16.mxu0 %v2198_v13  ;;  %1090 = vmatprep.mubr.bf16.mxu1 %v2200_v14 }
 0x121   : > { %963 = vmatmul.mubr.bf16.gmra.mrb[60].mxu0 %v2202_v15  ;;  %1091 = vmatmul.mubr.bf16.gmra.mrb[60].mxu1 %v2203_v16 }
 0x17c   : > { %v844_v18 = vpop.f32.mrb[0].mxu0  ;;  %v972_v20 = vpop.f32.mrb[0].mxu1 }
 0x17d   : > { %v1106_v21 = vmul.f32 %v2687_v17, %v844_v18  ;;  %v1138_v22 = vmul.f32 %v2687_v17, %v972_v20  ;;  %v846_v23 = vpop.f32.mrb[1].mxu0  ;;  %v974_v24 = vpop.f32.mrb[1].mxu1 }
 0x17e   : > { %v847_v25 = vpop.f32.mrb[2].mxu0  ;;  %v975_v26 = vpop.f32.mrb[2].mxu1 }
 0x17f   : > { %v1177_v27 = vadd.f32 %v2689_v19, %v1106_v21  ;;  %v1209_v28 = vadd.f32 %v2689_v19, %v1138_v22  ;;  %v1107_v29 = vmul.f32 %v2687_v17, %v847_v25  ;;  %v1139_v30 = vmul.f32 %v2687_v17, %v975_v26  ;;  %v849_v31 = vpop.f32.mrb[3].mxu0  ;;  %v977_v32 = vpop.f32.mrb[3].mxu1 }
 0x181   : > { %v1241_v33 = vmax.f32 %v1177_v27, 0.0  ;;  %v1273_v34 = vmax.f32 %v1209_v28, 0.0  ;;  %v1178_v35 = vadd.f32 %v2689_v19, %v1107_v29  ;;  %v1210_v36 = vadd.f32 %v2689_v19, %v1139_v30 }
 0x183   : > { %v1917_v37 = vpack.c.bf16 %v1241_v33, %v1241_v33  ;;  %v1949_v38 = vpack.c.bf16 %v1273_v34, %v1273_v34  ;;  %v1242_v39 = vmax.f32 %v1178_v35, 0.0  ;;  %v1274_v40 = vmax.f32 %v1210_v36, 0.0 }
 0x184   : > { %v852_v41 = vpop.f32.mrb[4].mxu0  ;;  %v980_v42 = vpop.f32.mrb[4].mxu1 }
 0x185   : > { %1562 = vst.msk [vmem:[%s2702_s12] sm:$0xf] %vm1561_vm0, %v1917_v37  ;;  %1594 = vst.msk [vmem:[%s2702_s12 + $0x80] sm:$0xf] %vm1561_vm0, %v1949_v38  ;;  %v1918_v43 = vpack.c.bf16 %v1242_v39, %v1242_v39  ;;  %v1950_v44 = vpack.c.bf16 %v1274_v40, %v1274_v40  ;;  %v1108_v45 = vmul.f32 %v2687_v17, %v852_v41  ;;  %v854_v47 = vpop.f32.mrb[5].mxu0  ;;  %v982_v48 = vpop.f32.mrb[5].mxu1 }
 0x186   : > { %v1140_v46 = vmul.f32 %v2687_v17, %v980_v42  ;;  %v855_v49 = vpop.f32.mrb[6].mxu0  ;;  %v983_v50 = vpop.f32.mrb[6].mxu1 }
 0x187   : > { %1563 = vst.msk [vmem:[%s2702_s12 + $0x4] sm:$0xf] %vm1561_vm0, %v1918_v43  ;;  %1595 = vst.msk [vmem:[%s2702_s12 + $0x84] sm:$0xf] %vm1561_vm0, %v1950_v44  ;;  %v1179_v51 = vadd.f32 %v2689_v19, %v1108_v45  ;;  %v1109_v53 = vmul.f32 %v2687_v17, %v855_v49  ;;  %v1141_v54 = vmul.f32 %v2687_v17, %v983_v50  ;;  %v857_v55 = vpop.f32.mrb[7].mxu0  ;;  %v985_v56 = vpop.f32.mrb[7].mxu1 }
 0x188   : > { %v1211_v52 = vadd.f32 %v2689_v19, %v1140_v46 }
 0x189   : > { %v1243_v57 = vmax.f32 %v1179_v51, 0.0  ;;  %v1180_v59 = vadd.f32 %v2689_v19, %v1109_v53  ;;  %v1212_v60 = vadd.f32 %v2689_v19, %v1141_v54 }
 0x18a   : > { %v1275_v58 = vmax.f32 %v1211_v52, 0.0 }
 0x18b   : > { %v1919_v61 = vpack.c.bf16 %v1243_v57, %v1243_v57  ;;  %v1244_v63 = vmax.f32 %v1180_v59, 0.0  ;;  %v1276_v0 = vmax.f32 %v1212_v60, 0.0 }
 0x18c   : > { %v1951_v62 = vpack.c.bf16 %v1275_v58, %v1275_v58  ;;  %v860_v1 = vpop.f32.mrb[8].mxu0  ;;  %v988_v2 = vpop.f32.mrb[8].mxu1 }
 0x18d   : > { %1564 = vst.msk [vmem:[%s2702_s12 + $0x8] sm:$0xf] %vm1561_vm0, %v1919_v61  ;;  %v1920_v3 = vpack.c.bf16 %v1244_v63, %v1244_v63  ;;  %v1952_v4 = vpack.c.bf16 %v1276_v0, %v1276_v0  ;;  %v1110_v5 = vmul.f32 %v2687_v17, %v860_v1  ;;  %v1142_v6 = vmul.f32 %v2687_v17, %v988_v2  ;;  %v862_v7 = vpop.f32.mrb[9].mxu0  ;;  %v990_v8 = vpop.f32.mrb[9].mxu1 }
 0x18e   : > { %1596 = vst.msk [vmem:[%s2702_s12 + $0x88] sm:$0xf] %vm1561_vm0, %v1951_v62  ;;  %v863_v9 = vpop.f32.mrb[10].mxu0  ;;  %v991_v10 = vpop.f32.mrb[10].mxu1 }
 0x18f   : > { %1565 = vst.msk [vmem:[%s2702_s12 + $0xc] sm:$0xf] %vm1561_vm0, %v1920_v3  ;;  %1597 = vst.msk [vmem:[%s2702_s12 + $0x8c] sm:$0xf] %vm1561_vm0, %v1952_v4  ;;  %v1181_v11 = vadd.f32 %v2689_v19, %v1110_v5  ;;  %v1213_v12 = vadd.f32 %v2689_v19, %v1142_v6  ;;  %v1111_v13 = vmul.f32 %v2687_v17, %v863_v9  ;;  %v865_v15 = vpop.f32.mrb[11].mxu0  ;;  %v993_v16 = vpop.f32.mrb[11].mxu1 }
 0x190   : > { %v1143_v14 = vmul.f32 %v2687_v17, %v991_v10 }
 0x191   : > { %v1245_v18 = vmax.f32 %v1181_v11, 0.0  ;;  %v1277_v20 = vmax.f32 %v1213_v12, 0.0  ;;  %v1182_v21 = vadd.f32 %v2689_v19, %v1111_v13 }
 0x192   : > { %v1214_v22 = vadd.f32 %v2689_v19, %v1143_v14 }
 0x193   : > { %v1921_v23 = vpack.c.bf16 %v1245_v18, %v1245_v18  ;;  %v1953_v24 = vpack.c.bf16 %v1277_v20, %v1277_v20  ;;  %v1246_v25 = vmax.f32 %v1182_v21, 0.0 }
 0x194   : > { %v1278_v26 = vmax.f32 %v1214_v22, 0.0  ;;  %v868_v27 = vpop.f32.mrb[12].mxu0  ;;  %v996_v28 = vpop.f32.mrb[12].mxu1 }
 0x195   : > { %1566 = vst.msk [vmem:[%s2702_s12 + $0x10] sm:$0xf] %vm1561_vm0, %v1921_v23  ;;  %1598 = vst.msk [vmem:[%s2702_s12 + $0x90] sm:$0xf] %vm1561_vm0, %v1953_v24  ;;  %v1922_v29 = vpack.c.bf16 %v1246_v25, %v1246_v25  ;;  %v1112_v31 = vmul.f32 %v2687_v17, %v868_v27  ;;  %v1144_v32 = vmul.f32 %v2687_v17, %v996_v28  ;;  %v870_v33 = vpop.f32.mrb[13].mxu0  ;;  %v998_v34 = vpop.f32.mrb[13].mxu1 }
 0x196   : > { %v1954_v30 = vpack.c.bf16 %v1278_v26, %v1278_v26  ;;  %v871_v35 = vpop.f32.mrb[14].mxu0  ;;  %v999_v36 = vpop.f32.mrb[14].mxu1 }
 0x197   : > { %1567 = vst.msk [vmem:[%s2702_s12 + $0x14] sm:$0xf] %vm1561_vm0, %v1922_v29  ;;  %v1183_v37 = vadd.f32 %v2689_v19, %v1112_v31  ;;  %v1215_v38 = vadd.f32 %v2689_v19, %v1144_v32  ;;  %v1113_v39 = vmul.f32 %v2687_v17, %v871_v35  ;;  %v1145_v40 = vmul.f32 %v2687_v17, %v999_v36  ;;  %v873_v41 = vpop.f32.mrb[15].mxu0  ;;  %v1001_v42 = vpop.f32.mrb[15].mxu1 }
 0x198   : > { %1599 = vst.msk [vmem:[%s2702_s12 + $0x94] sm:$0xf] %vm1561_vm0, %v1954_v30 }
 0x199   : > { %v1247_v43 = vmax.f32 %v1183_v37, 0.0  ;;  %v1279_v44 = vmax.f32 %v1215_v38, 0.0  ;;  %v1184_v45 = vadd.f32 %v2689_v19, %v1113_v39  ;;  %v1216_v46 = vadd.f32 %v2689_v19, %v1145_v40 }
 0x19b   : > { %v1923_v47 = vpack.c.bf16 %v1247_v43, %v1247_v43  ;;  %v1955_v48 = vpack.c.bf16 %v1279_v44, %v1279_v44  ;;  %v1248_v49 = vmax.f32 %v1184_v45, 0.0  ;;  %v1280_v50 = vmax.f32 %v1216_v46, 0.0 }
 0x19c   : > { %v876_v51 = vpop.f32.mrb[16].mxu0  ;;  %v1004_v52 = vpop.f32.mrb[16].mxu1 }
 0x19d   : > { %1568 = vst.msk [vmem:[%s2702_s12 + $0x18] sm:$0xf] %vm1561_vm0, %v1923_v47  ;;  %1600 = vst.msk [vmem:[%s2702_s12 + $0x98] sm:$0xf] %vm1561_vm0, %v1955_v48  ;;  %v1924_v53 = vpack.c.bf16 %v1248_v49, %v1248_v49  ;;  %v1956_v54 = vpack.c.bf16 %v1280_v50, %v1280_v50  ;;  %v1114_v55 = vmul.f32 %v2687_v17, %v876_v51  ;;  %v878_v57 = vpop.f32.mrb[17].mxu0  ;;  %v1006_v58 = vpop.f32.mrb[17].mxu1 }
 0x19e   : > { %v1146_v56 = vmul.f32 %v2687_v17, %v1004_v52  ;;  %v879_v59 = vpop.f32.mrb[18].mxu0  ;;  %v1007_v60 = vpop.f32.mrb[18].mxu1 }
 0x19f   : > { %1569 = vst.msk [vmem:[%s2702_s12 + $0x1c] sm:$0xf] %vm1561_vm0, %v1924_v53  ;;  %1601 = vst.msk [vmem:[%s2702_s12 + $0x9c] sm:$0xf] %vm1561_vm0, %v1956_v54  ;;  %v1185_v61 = vadd.f32 %v2689_v19, %v1114_v55  ;;  %v1115_v63 = vmul.f32 %v2687_v17, %v879_v59  ;;  %v1147_v0 = vmul.f32 %v2687_v17, %v1007_v60  ;;  %v881_v1 = vpop.f32.mrb[19].mxu0  ;;  %v1009_v2 = vpop.f32.mrb[19].mxu1 }
 0x1a0   : > { %v1217_v62 = vadd.f32 %v2689_v19, %v1146_v56 }
 0x1a1   : > { %v1249_v3 = vmax.f32 %v1185_v61, 0.0  ;;  %v1186_v5 = vadd.f32 %v2689_v19, %v1115_v63  ;;  %v1218_v6 = vadd.f32 %v2689_v19, %v1147_v0 }
 0x1a2   : > { %v1281_v4 = vmax.f32 %v1217_v62, 0.0 }
 0x1a3   : > { %v1925_v7 = vpack.c.bf16 %v1249_v3, %v1249_v3  ;;  %v1250_v9 = vmax.f32 %v1186_v5, 0.0  ;;  %v1282_v10 = vmax.f32 %v1218_v6, 0.0 }
 0x1a4   : > { %v1957_v8 = vpack.c.bf16 %v1281_v4, %v1281_v4  ;;  %v884_v11 = vpop.f32.mrb[20].mxu0  ;;  %v1012_v12 = vpop.f32.mrb[20].mxu1 }
 0x1a5   : > { %1570 = vst.msk [vmem:[%s2702_s12 + $0x20] sm:$0xf] %vm1561_vm0, %v1925_v7  ;;  %v1926_v13 = vpack.c.bf16 %v1250_v9, %v1250_v9  ;;  %v1958_v14 = vpack.c.bf16 %v1282_v10, %v1282_v10  ;;  %v1116_v15 = vmul.f32 %v2687_v17, %v884_v11  ;;  %v1148_v16 = vmul.f32 %v2687_v17, %v1012_v12  ;;  %v886_v18 = vpop.f32.mrb[21].mxu0  ;;  %v1014_v20 = vpop.f32.mrb[21].mxu1 }
 0x1a6   : > { %1602 = vst.msk [vmem:[%s2702_s12 + $0xa0] sm:$0xf] %vm1561_vm0, %v1957_v8  ;;  %v887_v21 = vpop.f32.mrb[22].mxu0  ;;  %v1015_v22 = vpop.f32.mrb[22].mxu1 }
 0x1a7   : > { %1571 = vst.msk [vmem:[%s2702_s12 + $0x24] sm:$0xf] %vm1561_vm0, %v1926_v13  ;;  %1603 = vst.msk [vmem:[%s2702_s12 + $0xa4] sm:$0xf] %vm1561_vm0, %v1958_v14  ;;  %v1187_v23 = vadd.f32 %v2689_v19, %v1116_v15  ;;  %v1219_v24 = vadd.f32 %v2689_v19, %v1148_v16  ;;  %v1117_v25 = vmul.f32 %v2687_v17, %v887_v21  ;;  %v889_v27 = vpop.f32.mrb[23].mxu0  ;;  %v1017_v28 = vpop.f32.mrb[23].mxu1 }
 0x1a8   : > { %v1149_v26 = vmul.f32 %v2687_v17, %v1015_v22 }
 0x1a9   : > { %v1251_v29 = vmax.f32 %v1187_v23, 0.0  ;;  %v1283_v30 = vmax.f32 %v1219_v24, 0.0  ;;  %v1188_v31 = vadd.f32 %v2689_v19, %v1117_v25 }
 0x1aa   : > { %v1220_v32 = vadd.f32 %v2689_v19, %v1149_v26 }
 0x1ab   : > { %v1927_v33 = vpack.c.bf16 %v1251_v29, %v1251_v29  ;;  %v1959_v34 = vpack.c.bf16 %v1283_v30, %v1283_v30  ;;  %v1252_v35 = vmax.f32 %v1188_v31, 0.0 }
 0x1ac   : > { %v1284_v36 = vmax.f32 %v1220_v32, 0.0  ;;  %v892_v37 = vpop.f32.mrb[24].mxu0  ;;  %v1020_v38 = vpop.f32.mrb[24].mxu1 }
 0x1ad   : > { %1572 = vst.msk [vmem:[%s2702_s12 + $0x28] sm:$0xf] %vm1561_vm0, %v1927_v33  ;;  %1604 = vst.msk [vmem:[%s2702_s12 + $0xa8] sm:$0xf] %vm1561_vm0, %v1959_v34  ;;  %v1928_v39 = vpack.c.bf16 %v1252_v35, %v1252_v35  ;;  %v1118_v41 = vmul.f32 %v2687_v17, %v892_v37  ;;  %v1150_v42 = vmul.f32 %v2687_v17, %v1020_v38  ;;  %v894_v43 = vpop.f32.mrb[25].mxu0  ;;  %v1022_v44 = vpop.f32.mrb[25].mxu1 }
 0x1ae   : > { %v1960_v40 = vpack.c.bf16 %v1284_v36, %v1284_v36  ;;  %v895_v45 = vpop.f32.mrb[26].mxu0  ;;  %v1023_v46 = vpop.f32.mrb[26].mxu1 }
 0x1af   : > { %1573 = vst.msk [vmem:[%s2702_s12 + $0x2c] sm:$0xf] %vm1561_vm0, %v1928_v39  ;;  %v1189_v47 = vadd.f32 %v2689_v19, %v1118_v41  ;;  %v1221_v48 = vadd.f32 %v2689_v19, %v1150_v42  ;;  %v1119_v49 = vmul.f32 %v2687_v17, %v895_v45  ;;  %v1151_v50 = vmul.f32 %v2687_v17, %v1023_v46  ;;  %v897_v51 = vpop.f32.mrb[27].mxu0  ;;  %v1025_v52 = vpop.f32.mrb[27].mxu1 }
 0x1b0   : > { %1605 = vst.msk [vmem:[%s2702_s12 + $0xac] sm:$0xf] %vm1561_vm0, %v1960_v40 }
 0x1b1   : > { %v1253_v53 = vmax.f32 %v1189_v47, 0.0  ;;  %v1285_v54 = vmax.f32 %v1221_v48, 0.0  ;;  %v1190_v55 = vadd.f32 %v2689_v19, %v1119_v49  ;;  %v1222_v56 = vadd.f32 %v2689_v19, %v1151_v50 }
 0x1b3   : > { %v1929_v57 = vpack.c.bf16 %v1253_v53, %v1253_v53  ;;  %v1961_v58 = vpack.c.bf16 %v1285_v54, %v1285_v54  ;;  %v1254_v59 = vmax.f32 %v1190_v55, 0.0  ;;  %v1286_v60 = vmax.f32 %v1222_v56, 0.0 }
 0x1b4   : > { %v900_v61 = vpop.f32.mrb[28].mxu0  ;;  %v1028_v62 = vpop.f32.mrb[28].mxu1 }
 0x1b5   : > { %1574 = vst.msk [vmem:[%s2702_s12 + $0x30] sm:$0xf] %vm1561_vm0, %v1929_v57  ;;  %1606 = vst.msk [vmem:[%s2702_s12 + $0xb0] sm:$0xf] %vm1561_vm0, %v1961_v58  ;;  %v1930_v63 = vpack.c.bf16 %v1254_v59, %v1254_v59  ;;  %v1962_v0 = vpack.c.bf16 %v1286_v60, %v1286_v60  ;;  %v1120_v1 = vmul.f32 %v2687_v17, %v900_v61  ;;  %v902_v3 = vpop.f32.mrb[29].mxu0  ;;  %v1030_v4 = vpop.f32.mrb[29].mxu1 }
 0x1b6   : > { %v1152_v2 = vmul.f32 %v2687_v17, %v1028_v62  ;;  %v903_v5 = vpop.f32.mrb[30].mxu0  ;;  %v1031_v6 = vpop.f32.mrb[30].mxu1 }
 0x1b7   : > { %1575 = vst.msk [vmem:[%s2702_s12 + $0x34] sm:$0xf] %vm1561_vm0, %v1930_v63  ;;  %1607 = vst.msk [vmem:[%s2702_s12 + $0xb4] sm:$0xf] %vm1561_vm0, %v1962_v0  ;;  %v1191_v7 = vadd.f32 %v2689_v19, %v1120_v1  ;;  %v1121_v9 = vmul.f32 %v2687_v17, %v903_v5  ;;  %v1153_v10 = vmul.f32 %v2687_v17, %v1031_v6  ;;  %v905_v11 = vpop.f32.mrb[31].mxu0  ;;  %v1033_v12 = vpop.f32.mrb[31].mxu1 }
 0x1b8   : > { %v1223_v8 = vadd.f32 %v2689_v19, %v1152_v2 }
 0x1b9   : > { %v1255_v13 = vmax.f32 %v1191_v7, 0.0  ;;  %v1192_v15 = vadd.f32 %v2689_v19, %v1121_v9  ;;  %v1224_v16 = vadd.f32 %v2689_v19, %v1153_v10 }
 0x1ba   : > { %v1287_v14 = vmax.f32 %v1223_v8, 0.0 }
 0x1bb   : > { %v1931_v18 = vpack.c.bf16 %v1255_v13, %v1255_v13  ;;  %v1256_v21 = vmax.f32 %v1192_v15, 0.0  ;;  %v1288_v22 = vmax.f32 %v1224_v16, 0.0 }
 0x1bc   : > { %v1963_v20 = vpack.c.bf16 %v1287_v14, %v1287_v14  ;;  %v908_v23 = vpop.f32.mrb[32].mxu0  ;;  %v1036_v24 = vpop.f32.mrb[32].mxu1 }
 0x1bd   : > { %1576 = vst.msk [vmem:[%s2702_s12 + $0x38] sm:$0xf] %vm1561_vm0, %v1931_v18  ;;  %v1932_v25 = vpack.c.bf16 %v1256_v21, %v1256_v21  ;;  %v1964_v26 = vpack.c.bf16 %v1288_v22, %v1288_v22  ;;  %v1122_v27 = vmul.f32 %v2687_v17, %v908_v23  ;;  %v1154_v28 = vmul.f32 %v2687_v17, %v1036_v24  ;;  %v910_v29 = vpop.f32.mrb[33].mxu0  ;;  %v1038_v30 = vpop.f32.mrb[33].mxu1 }
 0x1be   : > { %1608 = vst.msk [vmem:[%s2702_s12 + $0xb8] sm:$0xf] %vm1561_vm0, %v1963_v20  ;;  %v911_v31 = vpop.f32.mrb[34].mxu0  ;;  %v1039_v32 = vpop.f32.mrb[34].mxu1 }
 0x1bf   : > { %1577 = vst.msk [vmem:[%s2702_s12 + $0x3c] sm:$0xf] %vm1561_vm0, %v1932_v25  ;;  %1609 = vst.msk [vmem:[%s2702_s12 + $0xbc] sm:$0xf] %vm1561_vm0, %v1964_v26  ;;  %v1193_v33 = vadd.f32 %v2689_v19, %v1122_v27  ;;  %v1225_v34 = vadd.f32 %v2689_v19, %v1154_v28  ;;  %v1123_v35 = vmul.f32 %v2687_v17, %v911_v31  ;;  %v913_v37 = vpop.f32.mrb[35].mxu0  ;;  %v1041_v38 = vpop.f32.mrb[35].mxu1 }
 0x1c0   : > { %v1155_v36 = vmul.f32 %v2687_v17, %v1039_v32 }
 0x1c1   : > { %v1257_v39 = vmax.f32 %v1193_v33, 0.0  ;;  %v1289_v40 = vmax.f32 %v1225_v34, 0.0  ;;  %v1194_v41 = vadd.f32 %v2689_v19, %v1123_v35 }
 0x1c2   : > { %v1226_v42 = vadd.f32 %v2689_v19, %v1155_v36 }
 0x1c3   : > { %v1933_v43 = vpack.c.bf16 %v1257_v39, %v1257_v39  ;;  %v1965_v44 = vpack.c.bf16 %v1289_v40, %v1289_v40  ;;  %v1258_v45 = vmax.f32 %v1194_v41, 0.0 }
 0x1c4   : > { %v1290_v46 = vmax.f32 %v1226_v42, 0.0  ;;  %v916_v47 = vpop.f32.mrb[36].mxu0  ;;  %v1044_v48 = vpop.f32.mrb[36].mxu1 }
 0x1c5   : > { %1578 = vst.msk [vmem:[%s2702_s12 + $0x40] sm:$0xf] %vm1561_vm0, %v1933_v43  ;;  %1610 = vst.msk [vmem:[%s2702_s12 + $0xc0] sm:$0xf] %vm1561_vm0, %v1965_v44  ;;  %v1934_v49 = vpack.c.bf16 %v1258_v45, %v1258_v45  ;;  %v1124_v51 = vmul.f32 %v2687_v17, %v916_v47  ;;  %v1156_v52 = vmul.f32 %v2687_v17, %v1044_v48  ;;  %v918_v53 = vpop.f32.mrb[37].mxu0  ;;  %v1046_v54 = vpop.f32.mrb[37].mxu1 }
 0x1c6   : > { %v1966_v50 = vpack.c.bf16 %v1290_v46, %v1290_v46  ;;  %v919_v55 = vpop.f32.mrb[38].mxu0  ;;  %v1047_v56 = vpop.f32.mrb[38].mxu1 }
 0x1c7   : > { %1579 = vst.msk [vmem:[%s2702_s12 + $0x44] sm:$0xf] %vm1561_vm0, %v1934_v49  ;;  %v1195_v57 = vadd.f32 %v2689_v19, %v1124_v51  ;;  %v1227_v58 = vadd.f32 %v2689_v19, %v1156_v52  ;;  %v1125_v59 = vmul.f32 %v2687_v17, %v919_v55  ;;  %v1157_v60 = vmul.f32 %v2687_v17, %v1047_v56  ;;  %v921_v61 = vpop.f32.mrb[39].mxu0  ;;  %v1049_v62 = vpop.f32.mrb[39].mxu1 }
 0x1c8   : > { %1611 = vst.msk [vmem:[%s2702_s12 + $0xc4] sm:$0xf] %vm1561_vm0, %v1966_v50 }
 0x1c9   : > { %v1259_v63 = vmax.f32 %v1195_v57, 0.0  ;;  %v1291_v0 = vmax.f32 %v1227_v58, 0.0  ;;  %v1196_v1 = vadd.f32 %v2689_v19, %v1125_v59  ;;  %v1228_v2 = vadd.f32 %v2689_v19, %v1157_v60 }
 0x1cb   : > { %v1935_v3 = vpack.c.bf16 %v1259_v63, %v1259_v63  ;;  %v1967_v4 = vpack.c.bf16 %v1291_v0, %v1291_v0  ;;  %v1260_v5 = vmax.f32 %v1196_v1, 0.0  ;;  %v1292_v6 = vmax.f32 %v1228_v2, 0.0 }
 0x1cc   : > { %v924_v7 = vpop.f32.mrb[40].mxu0  ;;  %v1052_v8 = vpop.f32.mrb[40].mxu1 }
 0x1cd   : > { %1580 = vst.msk [vmem:[%s2702_s12 + $0x48] sm:$0xf] %vm1561_vm0, %v1935_v3  ;;  %1612 = vst.msk [vmem:[%s2702_s12 + $0xc8] sm:$0xf] %vm1561_vm0, %v1967_v4  ;;  %v1936_v9 = vpack.c.bf16 %v1260_v5, %v1260_v5  ;;  %v1968_v10 = vpack.c.bf16 %v1292_v6, %v1292_v6  ;;  %v1126_v11 = vmul.f32 %v2687_v17, %v924_v7  ;;  %v926_v13 = vpop.f32.mrb[41].mxu0  ;;  %v1054_v14 = vpop.f32.mrb[41].mxu1 }
 0x1ce   : > { %v1158_v12 = vmul.f32 %v2687_v17, %v1052_v8  ;;  %v927_v15 = vpop.f32.mrb[42].mxu0  ;;  %v1055_v16 = vpop.f32.mrb[42].mxu1 }
 0x1cf   : > { %1581 = vst.msk [vmem:[%s2702_s12 + $0x4c] sm:$0xf] %vm1561_vm0, %v1936_v9  ;;  %1613 = vst.msk [vmem:[%s2702_s12 + $0xcc] sm:$0xf] %vm1561_vm0, %v1968_v10  ;;  %v1197_v18 = vadd.f32 %v2689_v19, %v1126_v11  ;;  %v1127_v21 = vmul.f32 %v2687_v17, %v927_v15  ;;  %v1159_v22 = vmul.f32 %v2687_v17, %v1055_v16  ;;  %v929_v23 = vpop.f32.mrb[43].mxu0  ;;  %v1057_v24 = vpop.f32.mrb[43].mxu1 }
 0x1d0   : > { %v1229_v20 = vadd.f32 %v2689_v19, %v1158_v12 }
 0x1d1   : > { %v1261_v25 = vmax.f32 %v1197_v18, 0.0  ;;  %v1198_v27 = vadd.f32 %v2689_v19, %v1127_v21  ;;  %v1230_v28 = vadd.f32 %v2689_v19, %v1159_v22 }
 0x1d2   : > { %v1293_v26 = vmax.f32 %v1229_v20, 0.0 }
 0x1d3   : > { %v1937_v29 = vpack.c.bf16 %v1261_v25, %v1261_v25  ;;  %v1262_v31 = vmax.f32 %v1198_v27, 0.0  ;;  %v1294_v32 = vmax.f32 %v1230_v28, 0.0 }
 0x1d4   : > { %v1969_v30 = vpack.c.bf16 %v1293_v26, %v1293_v26  ;;  %v932_v33 = vpop.f32.mrb[44].mxu0  ;;  %v1060_v34 = vpop.f32.mrb[44].mxu1 }
 0x1d5   : > { %1582 = vst.msk [vmem:[%s2702_s12 + $0x50] sm:$0xf] %vm1561_vm0, %v1937_v29  ;;  %v1938_v35 = vpack.c.bf16 %v1262_v31, %v1262_v31  ;;  %v1970_v36 = vpack.c.bf16 %v1294_v32, %v1294_v32  ;;  %v1128_v37 = vmul.f32 %v2687_v17, %v932_v33  ;;  %v1160_v38 = vmul.f32 %v2687_v17, %v1060_v34  ;;  %v934_v39 = vpop.f32.mrb[45].mxu0  ;;  %v1062_v40 = vpop.f32.mrb[45].mxu1 }
 0x1d6   : > { %1614 = vst.msk [vmem:[%s2702_s12 + $0xd0] sm:$0xf] %vm1561_vm0, %v1969_v30  ;;  %v935_v41 = vpop.f32.mrb[46].mxu0  ;;  %v1063_v42 = vpop.f32.mrb[46].mxu1 }
 0x1d7   : > { %1583 = vst.msk [vmem:[%s2702_s12 + $0x54] sm:$0xf] %vm1561_vm0, %v1938_v35  ;;  %1615 = vst.msk [vmem:[%s2702_s12 + $0xd4] sm:$0xf] %vm1561_vm0, %v1970_v36  ;;  %v1199_v43 = vadd.f32 %v2689_v19, %v1128_v37  ;;  %v1231_v44 = vadd.f32 %v2689_v19, %v1160_v38  ;;  %v1129_v45 = vmul.f32 %v2687_v17, %v935_v41  ;;  %v937_v47 = vpop.f32.mrb[47].mxu0  ;;  %v1065_v48 = vpop.f32.mrb[47].mxu1 }
 0x1d8   : > { %v1161_v46 = vmul.f32 %v2687_v17, %v1063_v42 }
 0x1d9   : > { %v1263_v49 = vmax.f32 %v1199_v43, 0.0  ;;  %v1295_v50 = vmax.f32 %v1231_v44, 0.0  ;;  %v1200_v51 = vadd.f32 %v2689_v19, %v1129_v45 }
 0x1da   : > { %v1232_v52 = vadd.f32 %v2689_v19, %v1161_v46 }
 0x1db   : > { %v1939_v53 = vpack.c.bf16 %v1263_v49, %v1263_v49  ;;  %v1971_v54 = vpack.c.bf16 %v1295_v50, %v1295_v50  ;;  %v1264_v55 = vmax.f32 %v1200_v51, 0.0 }
 0x1dc   : > { %v1296_v56 = vmax.f32 %v1232_v52, 0.0  ;;  %v940_v57 = vpop.f32.mrb[48].mxu0  ;;  %v1068_v58 = vpop.f32.mrb[48].mxu1 }
 0x1dd   : > { %1584 = vst.msk [vmem:[%s2702_s12 + $0x58] sm:$0xf] %vm1561_vm0, %v1939_v53  ;;  %1616 = vst.msk [vmem:[%s2702_s12 + $0xd8] sm:$0xf] %vm1561_vm0, %v1971_v54  ;;  %v1940_v59 = vpack.c.bf16 %v1264_v55, %v1264_v55  ;;  %v1130_v61 = vmul.f32 %v2687_v17, %v940_v57  ;;  %v1162_v62 = vmul.f32 %v2687_v17, %v1068_v58  ;;  %v942_v63 = vpop.f32.mrb[49].mxu0  ;;  %v1070_v0 = vpop.f32.mrb[49].mxu1 }
 0x1de   : > { %v1972_v60 = vpack.c.bf16 %v1296_v56, %v1296_v56  ;;  %v943_v1 = vpop.f32.mrb[50].mxu0  ;;  %v1071_v2 = vpop.f32.mrb[50].mxu1 }
 0x1df   : > { %1585 = vst.msk [vmem:[%s2702_s12 + $0x5c] sm:$0xf] %vm1561_vm0, %v1940_v59  ;;  %v1201_v3 = vadd.f32 %v2689_v19, %v1130_v61  ;;  %v1233_v4 = vadd.f32 %v2689_v19, %v1162_v62  ;;  %v1131_v5 = vmul.f32 %v2687_v17, %v943_v1  ;;  %v1163_v6 = vmul.f32 %v2687_v17, %v1071_v2  ;;  %v945_v7 = vpop.f32.mrb[51].mxu0  ;;  %v1073_v8 = vpop.f32.mrb[51].mxu1 }
 0x1e0   : > { %1617 = vst.msk [vmem:[%s2702_s12 + $0xdc] sm:$0xf] %vm1561_vm0, %v1972_v60 }
 0x1e1   : > { %v1265_v9 = vmax.f32 %v1201_v3, 0.0  ;;  %v1297_v10 = vmax.f32 %v1233_v4, 0.0  ;;  %v1202_v11 = vadd.f32 %v2689_v19, %v1131_v5  ;;  %v1234_v12 = vadd.f32 %v2689_v19, %v1163_v6 }
 0x1e3   : > { %v1941_v13 = vpack.c.bf16 %v1265_v9, %v1265_v9  ;;  %v1973_v14 = vpack.c.bf16 %v1297_v10, %v1297_v10  ;;  %v1266_v15 = vmax.f32 %v1202_v11, 0.0  ;;  %v1298_v16 = vmax.f32 %v1234_v12, 0.0 }
 0x1e4   : > { %v948_v18 = vpop.f32.mrb[52].mxu0  ;;  %v1076_v20 = vpop.f32.mrb[52].mxu1 }
 0x1e5   : > { %1586 = vst.msk [vmem:[%s2702_s12 + $0x60] sm:$0xf] %vm1561_vm0, %v1941_v13  ;;  %1618 = vst.msk [vmem:[%s2702_s12 + $0xe0] sm:$0xf] %vm1561_vm0, %v1973_v14  ;;  %v1942_v21 = vpack.c.bf16 %v1266_v15, %v1266_v15  ;;  %v1974_v22 = vpack.c.bf16 %v1298_v16, %v1298_v16  ;;  %v1132_v23 = vmul.f32 %v2687_v17, %v948_v18  ;;  %v950_v25 = vpop.f32.mrb[53].mxu0  ;;  %v1078_v26 = vpop.f32.mrb[53].mxu1 }
 0x1e6   : > { %v1164_v24 = vmul.f32 %v2687_v17, %v1076_v20  ;;  %v951_v27 = vpop.f32.mrb[54].mxu0  ;;  %v1079_v28 = vpop.f32.mrb[54].mxu1 }
 0x1e7   : > { %1587 = vst.msk [vmem:[%s2702_s12 + $0x64] sm:$0xf] %vm1561_vm0, %v1942_v21  ;;  %1619 = vst.msk [vmem:[%s2702_s12 + $0xe4] sm:$0xf] %vm1561_vm0, %v1974_v22  ;;  %v1203_v29 = vadd.f32 %v2689_v19, %v1132_v23  ;;  %v1133_v31 = vmul.f32 %v2687_v17, %v951_v27  ;;  %v1165_v32 = vmul.f32 %v2687_v17, %v1079_v28  ;;  %v953_v33 = vpop.f32.mrb[55].mxu0  ;;  %v1081_v34 = vpop.f32.mrb[55].mxu1 }
 0x1e8   : > { %v1235_v30 = vadd.f32 %v2689_v19, %v1164_v24 }
 0x1e9   : > { %v1267_v35 = vmax.f32 %v1203_v29, 0.0  ;;  %v1204_v37 = vadd.f32 %v2689_v19, %v1133_v31  ;;  %v1236_v38 = vadd.f32 %v2689_v19, %v1165_v32 }
 0x1ea   : > { %v1299_v36 = vmax.f32 %v1235_v30, 0.0 }
 0x1eb   : > { %v1943_v39 = vpack.c.bf16 %v1267_v35, %v1267_v35  ;;  %v1268_v41 = vmax.f32 %v1204_v37, 0.0  ;;  %v1300_v42 = vmax.f32 %v1236_v38, 0.0 }
 0x1ec   : > { %v1975_v40 = vpack.c.bf16 %v1299_v36, %v1299_v36  ;;  %v956_v43 = vpop.f32.mrb[56].mxu0  ;;  %v1084_v44 = vpop.f32.mrb[56].mxu1 }
 0x1ed   : > { %1588 = vst.msk [vmem:[%s2702_s12 + $0x68] sm:$0xf] %vm1561_vm0, %v1943_v39  ;;  %v1944_v45 = vpack.c.bf16 %v1268_v41, %v1268_v41  ;;  %v1976_v46 = vpack.c.bf16 %v1300_v42, %v1300_v42  ;;  %v1134_v47 = vmul.f32 %v2687_v17, %v956_v43  ;;  %v1166_v48 = vmul.f32 %v2687_v17, %v1084_v44  ;;  %v958_v49 = vpop.f32.mrb[57].mxu0  ;;  %v1086_v50 = vpop.f32.mrb[57].mxu1 }
 0x1ee   : > { %1620 = vst.msk [vmem:[%s2702_s12 + $0xe8] sm:$0xf] %vm1561_vm0, %v1975_v40  ;;  %v959_v51 = vpop.f32.mrb[58].mxu0  ;;  %v1087_v52 = vpop.f32.mrb[58].mxu1 }
 0x1ef   : > { %1589 = vst.msk [vmem:[%s2702_s12 + $0x6c] sm:$0xf] %vm1561_vm0, %v1944_v45  ;;  %1621 = vst.msk [vmem:[%s2702_s12 + $0xec] sm:$0xf] %vm1561_vm0, %v1976_v46  ;;  %v1205_v53 = vadd.f32 %v2689_v19, %v1134_v47  ;;  %v1237_v54 = vadd.f32 %v2689_v19, %v1166_v48  ;;  %v1135_v55 = vmul.f32 %v2687_v17, %v959_v51  ;;  %v961_v57 = vpop.f32.mrb[59].mxu0  ;;  %v1089_v58 = vpop.f32.mrb[59].mxu1 }
 0x1f0   : > { %v1167_v56 = vmul.f32 %v2687_v17, %v1087_v52 }
 0x1f1   : > { %v1269_v59 = vmax.f32 %v1205_v53, 0.0  ;;  %v1301_v60 = vmax.f32 %v1237_v54, 0.0  ;;  %v1206_v61 = vadd.f32 %v2689_v19, %v1135_v55 }
 0x1f2   : > { %v1238_v62 = vadd.f32 %v2689_v19, %v1167_v56 }
 0x1f3   : > { %v1945_v63 = vpack.c.bf16 %v1269_v59, %v1269_v59  ;;  %v1977_v0 = vpack.c.bf16 %v1301_v60, %v1301_v60  ;;  %v1270_v1 = vmax.f32 %v1206_v61, 0.0 }
 0x1f4   : > { %v1302_v2 = vmax.f32 %v1238_v62, 0.0  ;;  %v964_v3 = vpop.f32.mrb[60].mxu0  ;;  %v1092_v4 = vpop.f32.mrb[60].mxu1 }
 0x1f5   : > { %1590 = vst.msk [vmem:[%s2702_s12 + $0x70] sm:$0xf] %vm1561_vm0, %v1945_v63  ;;  %1622 = vst.msk [vmem:[%s2702_s12 + $0xf0] sm:$0xf] %vm1561_vm0, %v1977_v0  ;;  %v1946_v5 = vpack.c.bf16 %v1270_v1, %v1270_v1  ;;  %v1136_v7 = vmul.f32 %v2687_v17, %v964_v3  ;;  %v1168_v8 = vmul.f32 %v2687_v17, %v1092_v4  ;;  %v966_v9 = vpop.f32.mrb[61].mxu0  ;;  %v1094_v10 = vpop.f32.mrb[61].mxu1 }
 0x1f6   : > { %v1978_v6 = vpack.c.bf16 %v1302_v2, %v1302_v2  ;;  %v967_v11 = vpop.f32.mrb[62].mxu0  ;;  %v1095_v12 = vpop.f32.mrb[62].mxu1 }
 0x1f7   : > { %1591 = vst.msk [vmem:[%s2702_s12 + $0x74] sm:$0xf] %vm1561_vm0, %v1946_v5  ;;  %v1207_v13 = vadd.f32 %v2689_v19, %v1136_v7  ;;  %v1239_v14 = vadd.f32 %v2689_v19, %v1168_v8  ;;  %v1137_v15 = vmul.f32 %v2687_v17, %v967_v11  ;;  %v1169_v16 = vmul.f32 %v2687_v17, %v1095_v12  ;;  %v969_v18 = vpop.f32.mrb[63].mxu0  ;;  %v1097_v20 = vpop.f32.mrb[63].mxu1 }
 0x1f8   : > { %1623 = vst.msk [vmem:[%s2702_s12 + $0xf4] sm:$0xf] %vm1561_vm0, %v1978_v6 }
 0x1f9   : > { %v1271_v21 = vmax.f32 %v1207_v13, 0.0  ;;  %v1303_v22 = vmax.f32 %v1239_v14, 0.0  ;;  %v1208_v23 = vadd.f32 %v2689_v19, %v1137_v15  ;;  %v1240_v24 = vadd.f32 %v2689_v19, %v1169_v16 }
 0x1fb   : > { %v1947_v25 = vpack.c.bf16 %v1271_v21, %v1271_v21  ;;  %v1979_v26 = vpack.c.bf16 %v1303_v22, %v1303_v22  ;;  %v1272_v27 = vmax.f32 %v1208_v23, 0.0  ;;  %v1304_v28 = vmax.f32 %v1240_v24, 0.0 }
 0x1fd   : > { %1592 = vst.msk [vmem:[%s2702_s12 + $0x78] sm:$0xf] %vm1561_vm0, %v1947_v25  ;;  %1624 = vst.msk [vmem:[%s2702_s12 + $0xf8] sm:$0xf] %vm1561_vm0, %v1979_v26  ;;  %v1948_v29 = vpack.c.bf16 %v1272_v27, %v1272_v27  ;;  %v1980_v30 = vpack.c.bf16 %v1304_v28, %v1304_v28 }
 0x1ff   : > { %1593 = vst.msk [vmem:[%s2702_s12 + $0x7c] sm:$0xf] %vm1561_vm0, %v1948_v29  ;;  %1625 = vst.msk [vmem:[%s2702_s12 + $0xfc] sm:$0xf] %vm1561_vm0, %v1980_v30 }
 0x200 PF: > { %s18_s20 = sadd.s32 1, %s2344_s20   ;;  %s2989_s15 = smov %s2328_s16 }
 0x201   : > { %p15_p5 = scmp.ge.s32.totalorder %s18_s20, 51   ;;  %s2990_s16 = smov %s2332_s17 }
 0x202   : > { %s2991_s17 = smov %s2499_s10  ;;  %s2992_s18 = smov %s2340_s19 }
 0x203   : > { %s2993_s19 = smov %s2995_s26  ;;  %17 = sbr.rel (!%p15_p5) target bundleno = 5 (0x5), region = 89 }
 0x20a   :  { %1654 = vsyncpa [#allocation3], 1 }
 0x20b   :  { %1656 = vsyncpa [#allocation3 + $0x1], 1 }
 0x20c   :  { %1657 = vsyncpa [#allocation5], 1 }

</bundles_post_ra>
